<compile_context>
chip_gen: v6e
topology: v6e:2x2x1
jax: 0.10.0
libtpu: 0.0.40
codegen_flags: <defaults>
</compile_context>

<pallas_src>
import math
from functools import partial

import jax
import jax.numpy as jnp
from jax import lax
from jax.experimental import pallas as pl
from jax.experimental.pallas import tpu as pltpu

EPS = 1e-5

CFG = dict(
    vocab_size=128,
    context_length=16,
    emb_dim=32,
    num_heads=4,
    n_layers=2,
    drop_rate=0.0,
    qkv_bias=False,
)


# ----------------------------- in-kernel helpers -----------------------------

def _layernorm(x, scale, shift):
    # Matches the PyTorch module: torch.var defaults to unbiased (N-1 divisor).
    D = x.shape[-1]
    mean = jnp.mean(x, axis=-1, keepdims=True)
    diff = x - mean
    var = jnp.sum(diff * diff, axis=-1, keepdims=True) * (1.0 / (D - 1))
    return scale * (diff * lax.rsqrt(var + EPS)) + shift


def _gelu_tanh(x):
    c = math.sqrt(2.0 / math.pi)
    return 0.5 * x * (1.0 + jnp.tanh(c * (x + 0.044715 * x * x * x)))


# ------------------------------- fused kernel --------------------------------

def gpt_fused_kernel(num_heads,
                     ids_ref, tok_ref, pos_ref, nrm_ref, wqkv_ref, wo_ref,
                     w1_ref, b1_ref, w2_ref, fs_ref, fb_ref, wout_ref,
                     bout_ref, o_ref, x_sc):
    l = pl.program_id(1)
    L = pl.num_programs(1)

    T, D = x_sc.shape
    H = num_heads
    hd = D // H
    V = tok_ref.shape[0]
    q_scale = 1.0 / math.sqrt(float(hd))

    # ---- l == 0: build embeddings (in-kernel gather) into the carry scratch --
    @pl.when(l == 0)
    def _():
        ids = ids_ref[...]                                     # (T, 1) int32
        iota = lax.broadcasted_iota(jnp.int32, (T, V), 1)
        onehot = (iota == ids).astype(jnp.float32)             # (T, V), exact
        tok = jnp.dot(onehot, tok_ref[...],
                      preferred_element_type=jnp.float32)      # (T, D)
        x_sc[...] = tok + pos_ref[...]                         # + positional

    x = x_sc[...]                                              # (T, D) carry

    # Packed small per-layer params: [ln1_s, ln1_b, ln2_s, ln2_b, out_b, ffn2_b]
    nrm = nrm_ref[...]                                         # (6, D)
    ln1_s = nrm[0:1, :]
    ln1_b = nrm[1:2, :]
    ln2_s = nrm[2:3, :]
    ln2_b = nrm[3:4, :]
    bo = nrm[4:5, :]
    b2 = nrm[5:6, :]

    # Causal mask (True => masked), matches torch.triu(ones, diagonal=1).
    row = lax.broadcasted_iota(jnp.int32, (T, T), 0)
    col = lax.broadcasted_iota(jnp.int32, (T, T), 1)
    causal = col > row
    neg_inf = jnp.float32(-jnp.inf)

    # ---- attention sub-block ----
    h = _layernorm(x, ln1_s, ln1_b)                            # (T, D)
    qkv = jnp.dot(h, wqkv_ref[...],
                  preferred_element_type=jnp.float32)          # (T, 3D)
    wo = wo_ref[...]                                           # (D, D)

    attn = jnp.zeros((T, D), jnp.float32)
    for hh in range(H):                                        # static, H tiny
        o0 = hh * hd
        q_h = qkv[:, o0:o0 + hd] * q_scale                     # (T, hd)
        k_h = qkv[:, D + o0:D + o0 + hd]                       # (T, hd)
        v_h = qkv[:, 2 * D + o0:2 * D + o0 + hd]               # (T, hd)

        s = lax.dot_general(q_h, k_h, (((1,), (1,)), ((), ())),
                            preferred_element_type=jnp.float32)  # (T, T)
        s = jnp.where(causal, neg_inf, s)
        m = jnp.max(s, axis=-1, keepdims=True)
        e = jnp.exp(s - m)
        p = e / jnp.sum(e, axis=-1, keepdims=True)              # exact softmax

        ctx_h = jnp.dot(p, v_h, preferred_element_type=jnp.float32)  # (T, hd)
        # Fold head output straight into the output projection (no concat).
        attn = attn + jnp.dot(ctx_h, wo[o0:o0 + hd, :],
                              preferred_element_type=jnp.float32)
    x = x + attn + bo                                          # dropout(0)=id

    # ---- feed-forward sub-block ----
    h = _layernorm(x, ln2_s, ln2_b)
    h = jnp.dot(h, w1_ref[...], preferred_element_type=jnp.float32) + b1_ref[...]
    h = _gelu_tanh(h)
    h = jnp.dot(h, w2_ref[...], preferred_element_type=jnp.float32) + b2
    x = x + h                                                  # dropout(0)=id

    x_sc[...] = x                                              # carry to l+1

    # ---- l == L-1: final LayerNorm + output head (lane-dense, V = 128) ----
    @pl.when(l == L - 1)
    def _():
        xf = _layernorm(x, fs_ref[...], fb_ref[...])
        logits = jnp.dot(xf, wout_ref[...],
                         preferred_element_type=jnp.float32) + bout_ref[...]
        o_ref[...] = logits.astype(o_ref.dtype)


# --------------------------------- wrapper ------------------------------------

def gpt_forward(params, in_ids, cfg):
    B, T = in_ids.shape
    V = cfg['vocab_size']
    D = cfg['emb_dim']
    L = cfg['n_layers']
    H = cfg['num_heads']
    F = 4 * D

    ids3 = in_ids.reshape(B, T, 1).astype(jnp.int32)   # metadata-only reshape
    pos = params['pos_emb'][:T]                         # static slice

    in_specs = [
        pl.BlockSpec((None, T, 1), lambda b, l: (b, 0, 0)),      # token ids
        pl.BlockSpec((V, D), lambda b, l: (0, 0)),               # tok_emb
        pl.BlockSpec((T, D), lambda b, l: (0, 0)),               # pos_emb[:T]
        pl.BlockSpec((None, 6, D), lambda b, l: (l, 0, 0)),      # packed norms/biases
        pl.BlockSpec((None, D, 3 * D), lambda b, l: (l, 0, 0)),  # fused Wqkv
        pl.BlockSpec((None, D, D), lambda b, l: (l, 0, 0)),      # Wo
        pl.BlockSpec((None, D, F), lambda b, l: (l, 0, 0)),      # FFN W1
        pl.BlockSpec((None, 1, F), lambda b, l: (l, 0, 0)),      # FFN b1
        pl.BlockSpec((None, F, D), lambda b, l: (l, 0, 0)),      # FFN W2
        pl.BlockSpec((1, D), lambda b, l: (0, 0)),               # final LN scale
        pl.BlockSpec((1, D), lambda b, l: (0, 0)),               # final LN shift
        pl.BlockSpec((D, V), lambda b, l: (0, 0)),               # out head W
        pl.BlockSpec((1, V), lambda b, l: (0, 0)),               # out head b
    ]
    out_spec = pl.BlockSpec((None, T, V), lambda b, l: (b, 0, 0))

    return pl.pallas_call(
        partial(gpt_fused_kernel, H),
        out_shape=jax.ShapeDtypeStruct((B, T, V), jnp.float32),
        grid=(B, L),
        in_specs=in_specs,
        out_specs=out_spec,
        scratch_shapes=[pltpu.VMEM((T, D), jnp.float32)],   # activation carry
        compiler_params=pltpu.CompilerParams(
            dimension_semantics=("parallel", "arbitrary"),
            vmem_limit_bytes=8 * 1024 * 1024),
    )(ids3, params['tok_emb'], pos, params['norms'], params['wqkv'],
      params['wo'], params['w1'], params['b1'], params['w2'],
      params['final_s'], params['final_b'], params['w_out'], params['b_out'])


# ----------------------------- parameter init ---------------------------------

def init_params(key, cfg):
    V, C, D = cfg['vocab_size'], cfg['context_length'], cfg['emb_dim']
    L = cfg['n_layers']
    F = 4 * D

    def lin(k, fan_in, fan_out):
        return jax.random.normal(k, (fan_in, fan_out), jnp.float32) * 0.02

    ks = jax.random.split(key, 3 + 6 * L)

    wqkv, wo, w1, w2, norms, b1 = [], [], [], [], [], []
    idx = 3
    for _ in range(L):
        kq, kk, kv, ko, k1, k2 = ks[idx:idx + 6]
        idx += 6
        # Fused QKV weight: (D, 3D), equivalent to the three separate Linears.
        wqkv.append(jnp.concatenate([lin(kq, D, D), lin(kk, D, D), lin(kv, D, D)],
                                    axis=1))
        wo.append(lin(ko, D, D))
        w1.append(lin(k1, D, F))
        w2.append(lin(k2, F, D))
        # Packed small params: [ln1_s, ln1_b, ln2_s, ln2_b, out_proj bias, ffn2 bias]
        norms.append(jnp.stack([jnp.ones(D, jnp.float32), jnp.zeros(D, jnp.float32),
                                jnp.ones(D, jnp.float32), jnp.zeros(D, jnp.float32),
                                jnp.zeros(D, jnp.float32), jnp.zeros(D, jnp.float32)]))
        b1.append(jnp.zeros((1, F), jnp.float32))

    return {
        'tok_emb': jax.random.normal(ks[0], (V, D), jnp.float32) * 0.02,
        'pos_emb': jax.random.normal(ks[1], (C, D), jnp.float32) * 0.02,
        'norms': jnp.stack(norms),           # (L, 6, D)
        'wqkv': jnp.stack(wqkv),             # (L, D, 3D)
        'wo': jnp.stack(wo),                 # (L, D, D)
        'w1': jnp.stack(w1),                 # (L, D, 4D)
        'b1': jnp.stack(b1),                 # (L, 1, 4D)
        'w2': jnp.stack(w2),                 # (L, 4D, D)
        'final_s': jnp.ones((1, D), jnp.float32),
        'final_b': jnp.zeros((1, D), jnp.float32),
        'w_out': lin(ks[2], D, V),           # (D, V)
        'b_out': jnp.zeros((1, V), jnp.float32),
    }


# ----------------------------------- main --------------------------------------

if __name__ == "__main__":
    key = jax.random.PRNGKey(0)
    pkey, dkey = jax.random.split(key)

    params = init_params(pkey, CFG)

    B, T = 2, 8  # batch=2, seq=8 (<= context_length=16)
    in_ids = jax.random.randint(dkey, (B, T), 0, CFG['vocab_size'], dtype=jnp.int32)

    fwd = jax.jit(partial(gpt_forward, cfg=CFG))
    logits = fwd(params, in_ids)
    logits = jax.block_until_ready(logits)

    assert logits.shape == (B, T, CFG['vocab_size'])
    assert bool(jnp.all(jnp.isfinite(logits)))
    print("KERNEL_OK")
</pallas_src>

<mosaic_0001>
module attributes {stable_mosaic.version = 11 : i64} {
  func.func @gpt_fused_kernel(%arg0: i32, %arg1: i32, %arg2: memref<1x8x1xi32, #tpu.memory_space<vmem>>, %arg3: memref<128x32xf32, #tpu.memory_space<vmem>>, %arg4: memref<8x32xf32, #tpu.memory_space<vmem>>, %arg5: memref<1x6x32xf32, #tpu.memory_space<vmem>>, %arg6: memref<1x32x96xf32, #tpu.memory_space<vmem>>, %arg7: memref<1x32x32xf32, #tpu.memory_space<vmem>>, %arg8: memref<1x32x128xf32, #tpu.memory_space<vmem>>, %arg9: memref<1x1x128xf32, #tpu.memory_space<vmem>>, %arg10: memref<1x128x32xf32, #tpu.memory_space<vmem>>, %arg11: memref<1x32xf32, #tpu.memory_space<vmem>>, %arg12: memref<1x32xf32, #tpu.memory_space<vmem>>, %arg13: memref<32x128xf32, #tpu.memory_space<vmem>>, %arg14: memref<1x128xf32, #tpu.memory_space<vmem>>, %arg15: memref<1x8x128xf32, #tpu.memory_space<vmem>>, %arg16: memref<8x32xf32, #tpu.memory_space<vmem>>) attributes {dimension_semantics = [#tpu.dimension_semantics<parallel>, #tpu.dimension_semantics<arbitrary>], iteration_bounds = array<i64: 2, 2>, scalar_prefetch = 0 : i64, scratch_operands = 1 : i64, tpu.core_type = #tpu.core_type<tc>, window_params = [{transform_indices = @transform_0, window_bounds = array<i64: 1, 8, 1>}, {pipeline_mode = #tpu.pipeline_mode<synchronous>, transform_indices = @transform_1, window_bounds = array<i64: 128, 32>}, {pipeline_mode = #tpu.pipeline_mode<synchronous>, transform_indices = @transform_2, window_bounds = array<i64: 8, 32>}, {transform_indices = @transform_3, window_bounds = array<i64: 1, 6, 32>}, {transform_indices = @transform_4, window_bounds = array<i64: 1, 32, 96>}, {transform_indices = @transform_5, window_bounds = array<i64: 1, 32, 32>}, {transform_indices = @transform_6, window_bounds = array<i64: 1, 32, 128>}, {transform_indices = @transform_7, window_bounds = array<i64: 1, 1, 128>}, {transform_indices = @transform_8, window_bounds = array<i64: 1, 128, 32>}, {pipeline_mode = #tpu.pipeline_mode<synchronous>, transform_indices = @transform_9, window_bounds = array<i64: 1, 32>}, {pipeline_mode = #tpu.pipeline_mode<synchronous>, transform_indices = @transform_10, window_bounds = array<i64: 1, 32>}, {pipeline_mode = #tpu.pipeline_mode<synchronous>, transform_indices = @transform_11, window_bounds = array<i64: 32, 128>}, {pipeline_mode = #tpu.pipeline_mode<synchronous>, transform_indices = @transform_12, window_bounds = array<i64: 1, 128>}, {transform_indices = @transform_13, window_bounds = array<i64: 1, 8, 128>}]} {
    %c0_i32 = arith.constant 0 : i32
    %0 = arith.cmpi eq, %arg1, %c0_i32 : i32
    %1 = arith.extui %0 : i1 to i32
    %c0_i32_0 = arith.constant 0 : i32
    %2 = arith.cmpi ne, %1, %c0_i32_0 : i32
    scf.if %2 {
      %c0_68 = arith.constant 0 : index
      %c0_69 = arith.constant 0 : index
      %c0_70 = arith.constant 0 : index
      %178 = vector.load %arg2[%c0_68, %c0_69, %c0_70] : memref<1x8x1xi32, #tpu.memory_space<vmem>>, vector<1x8x1xi32>
      %179 = vector.shape_cast %178 : vector<1x8x1xi32> to vector<8x1xi32>
      %180 = tpu.iota {dimensions = array<i32: 1>} : vector<8x128xi32>
      %181 = vector.broadcast %179 : vector<8x1xi32> to vector<8x128xi32>
      %182 = arith.cmpi eq, %180, %181 : vector<8x128xi32>
      %183 = arith.extui %182 : vector<8x128xi1> to vector<8x128xi32>
      %184 = arith.sitofp %183 : vector<8x128xi32> to vector<8x128xf32>
      %c0_71 = arith.constant 0 : index
      %c0_72 = arith.constant 0 : index
      %185 = vector.load %arg3[%c0_71, %c0_72] : memref<128x32xf32, #tpu.memory_space<vmem>>, vector<128x32xf32>
      %cst_73 = arith.constant dense<0.000000e+00> : vector<8x32xf32>
      %186 = tpu.matmul %184, %185, %cst_73 {dimension_numbers = #tpu.dot_dimension_numbers<[1], [0], [0], [1], [0, 0, 1, 1], [], []>} : vector<8x128xf32>, vector<128x32xf32>, vector<8x32xf32> -> vector<8x32xf32>
      %c0_74 = arith.constant 0 : index
      %c0_75 = arith.constant 0 : index
      %187 = vector.load %arg4[%c0_74, %c0_75] : memref<8x32xf32, #tpu.memory_space<vmem>>, vector<8x32xf32>
      %188 = arith.addf %186, %187 : vector<8x32xf32>
      %c0_76 = arith.constant 0 : index
      %c0_77 = arith.constant 0 : index
      %189 = vector.load %arg16[%c0_76, %c0_77] : memref<8x32xf32, #tpu.memory_space<vmem>>, vector<8x32xf32>
      tpu.vector_store %arg16[%c0_76, %c0_77], %188 {strides = array<i32>} : memref<8x32xf32, #tpu.memory_space<vmem>>, vector<8x32xf32>,
    } else {
    }
    %c0 = arith.constant 0 : index
    %c0_1 = arith.constant 0 : index
    %3 = vector.load %arg16[%c0, %c0_1] : memref<8x32xf32, #tpu.memory_space<vmem>>, vector<8x32xf32>
    %c0_2 = arith.constant 0 : index
    %c0_3 = arith.constant 0 : index
    %c0_4 = arith.constant 0 : index
    %4 = vector.load %arg5[%c0_2, %c0_3, %c0_4] : memref<1x6x32xf32, #tpu.memory_space<vmem>>, vector<1x6x32xf32>
    %5 = vector.shape_cast %4 : vector<1x6x32xf32> to vector<6x32xf32>
    %6 = vector.extract_strided_slice %5 {offsets = [0, 0], sizes = [1, 32], strides = [1, 1]} : vector<6x32xf32> to vector<1x32xf32>
    %7 = vector.extract_strided_slice %5 {offsets = [1, 0], sizes = [1, 32], strides = [1, 1]} : vector<6x32xf32> to vector<1x32xf32>
    %8 = vector.extract_strided_slice %5 {offsets = [2, 0], sizes = [1, 32], strides = [1, 1]} : vector<6x32xf32> to vector<1x32xf32>
    %9 = vector.extract_strided_slice %5 {offsets = [3, 0], sizes = [1, 32], strides = [1, 1]} : vector<6x32xf32> to vector<1x32xf32>
    %10 = vector.extract_strided_slice %5 {offsets = [4, 0], sizes = [1, 32], strides = [1, 1]} : vector<6x32xf32> to vector<1x32xf32>
    %11 = vector.extract_strided_slice %5 {offsets = [5, 0], sizes = [1, 32], strides = [1, 1]} : vector<6x32xf32> to vector<1x32xf32>
    %12 = tpu.iota {dimensions = array<i32: 0>} : vector<8x8xi32>
    %13 = tpu.iota {dimensions = array<i32: 1>} : vector<8x8xi32>
    %14 = arith.cmpi sgt, %13, %12 : vector<8x8xi32>
    %cst = arith.constant dense<0.000000e+00> : vector<8xf32>
    %15 = vector.multi_reduction <add>, %3, %cst [1] : vector<8x32xf32> to vector<8xf32>
    %16 = vector.shape_cast %15 : vector<8xf32> to vector<8x1xf32>
    %cst_5 = arith.constant 3.200000e+01 : f32
    %17 = vector.broadcast %cst_5 : f32 to vector<8x1xf32>
    %18 = arith.divf %16, %17 : vector<8x1xf32>
    %19 = vector.broadcast %18 : vector<8x1xf32> to vector<8x32xf32>
    %20 = arith.subf %3, %19 : vector<8x32xf32>
    %21 = arith.mulf %20, %20 : vector<8x32xf32>
    %cst_6 = arith.constant dense<0.000000e+00> : vector<8xf32>
    %22 = vector.multi_reduction <add>, %21, %cst_6 [1] : vector<8x32xf32> to vector<8xf32>
    %23 = vector.shape_cast %22 : vector<8xf32> to vector<8x1xf32>
    %cst_7 = arith.constant 0.0322580636 : f32
    %24 = vector.broadcast %cst_7 : f32 to vector<8x1xf32>
    %25 = arith.mulf %23, %24 : vector<8x1xf32>
    %cst_8 = arith.constant 9.99999974E-6 : f32
    %26 = vector.broadcast %cst_8 : f32 to vector<8x1xf32>
    %27 = arith.addf %25, %26 : vector<8x1xf32>
    %28 = math.rsqrt %27 : vector<8x1xf32>
    %29 = vector.broadcast %28 : vector<8x1xf32> to vector<8x32xf32>
    %30 = arith.mulf %20, %29 : vector<8x32xf32>
    %31 = vector.broadcast %6 : vector<1x32xf32> to vector<8x32xf32>
    %32 = arith.mulf %31, %30 : vector<8x32xf32>
    %33 = vector.broadcast %7 : vector<1x32xf32> to vector<8x32xf32>
    %34 = arith.addf %32, %33 : vector<8x32xf32>
    %c0_9 = arith.constant 0 : index
    %c0_10 = arith.constant 0 : index
    %c0_11 = arith.constant 0 : index
    %35 = vector.load %arg6[%c0_9, %c0_10, %c0_11] : memref<1x32x96xf32, #tpu.memory_space<vmem>>, vector<1x32x96xf32>
    %36 = vector.shape_cast %35 : vector<1x32x96xf32> to vector<32x96xf32>
    %cst_12 = arith.constant dense<0.000000e+00> : vector<8x96xf32>
    %37 = tpu.matmul %34, %36, %cst_12 {dimension_numbers = #tpu.dot_dimension_numbers<[1], [0], [0], [1], [0, 0, 1, 1], [], []>} : vector<8x32xf32>, vector<32x96xf32>, vector<8x96xf32> -> vector<8x96xf32>
    %c0_13 = arith.constant 0 : index
    %c0_14 = arith.constant 0 : index
    %c0_15 = arith.constant 0 : index
    %38 = vector.load %arg7[%c0_13, %c0_14, %c0_15] : memref<1x32x32xf32, #tpu.memory_space<vmem>>, vector<1x32x32xf32>
    %39 = vector.shape_cast %38 : vector<1x32x32xf32> to vector<32x32xf32>
    %cst_16 = arith.constant 0.000000e+00 : f32
    %40 = vector.broadcast %cst_16 : f32 to vector<8x32xf32>
    %41 = vector.extract_strided_slice %37 {offsets = [0, 0], sizes = [8, 8], strides = [1, 1]} : vector<8x96xf32> to vector<8x8xf32>
    %cst_17 = arith.constant 0.353553385 : f32
    %42 = vector.broadcast %cst_17 : f32 to vector<8x8xf32>
    %43 = arith.mulf %41, %42 : vector<8x8xf32>
    %44 = vector.extract_strided_slice %37 {offsets = [0, 32], sizes = [8, 8], strides = [1, 1]} : vector<8x96xf32> to vector<8x8xf32>
    %45 = vector.extract_strided_slice %37 {offsets = [0, 64], sizes = [8, 8], strides = [1, 1]} : vector<8x96xf32> to vector<8x8xf32>
    %cst_18 = arith.constant dense<0.000000e+00> : vector<8x8xf32>
    %46 = tpu.matmul %43, %44, %cst_18 {dimension_numbers = #tpu.dot_dimension_numbers<[1], [1], [0], [0], [0, 0, 1, 0], [], []>} : vector<8x8xf32>, vector<8x8xf32>, vector<8x8xf32> -> vector<8x8xf32>
    %cst_19 = arith.constant 0xFF800000 : f32
    %47 = vector.broadcast %cst_19 : f32 to vector<8x8xf32>
    %48 = arith.select %14, %47, %46 : vector<8x8xi1>, vector<8x8xf32>
    %cst_20 = arith.constant dense<0xFF800000> : vector<8xf32>
    %49 = vector.multi_reduction <maximumf>, %48, %cst_20 [1] : vector<8x8xf32> to vector<8xf32>
    %50 = vector.shape_cast %49 : vector<8xf32> to vector<8x1xf32>
    %51 = vector.broadcast %50 : vector<8x1xf32> to vector<8x8xf32>
    %52 = arith.subf %48, %51 : vector<8x8xf32>
    %53 = math.exp %52 : vector<8x8xf32>
    %cst_21 = arith.constant dense<0.000000e+00> : vector<8xf32>
    %54 = vector.multi_reduction <add>, %53, %cst_21 [1] : vector<8x8xf32> to vector<8xf32>
    %55 = vector.shape_cast %54 : vector<8xf32> to vector<8x1xf32>
    %56 = vector.broadcast %55 : vector<8x1xf32> to vector<8x8xf32>
    %57 = arith.divf %53, %56 : vector<8x8xf32>
    %cst_22 = arith.constant dense<0.000000e+00> : vector<8x8xf32>
    %58 = tpu.matmul %57, %45, %cst_22 {dimension_numbers = #tpu.dot_dimension_numbers<[1], [0], [0], [1], [0, 0, 1, 1], [], []>} : vector<8x8xf32>, vector<8x8xf32>, vector<8x8xf32> -> vector<8x8xf32>
    %59 = vector.extract_strided_slice %39 {offsets = [0, 0], sizes = [8, 32], strides = [1, 1]} : vector<32x32xf32> to vector<8x32xf32>
    %cst_23 = arith.constant dense<0.000000e+00> : vector<8x32xf32>
    %60 = tpu.matmul %58, %59, %cst_23 {dimension_numbers = #tpu.dot_dimension_numbers<[1], [0], [0], [1], [0, 0, 1, 1], [], []>} : vector<8x8xf32>, vector<8x32xf32>, vector<8x32xf32> -> vector<8x32xf32>
    %61 = arith.addf %40, %60 : vector<8x32xf32>
    %62 = vector.extract_strided_slice %37 {offsets = [0, 8], sizes = [8, 8], strides = [1, 1]} : vector<8x96xf32> to vector<8x8xf32>
    %cst_24 = arith.constant 0.353553385 : f32
    %63 = vector.broadcast %cst_24 : f32 to vector<8x8xf32>
    %64 = arith.mulf %62, %63 : vector<8x8xf32>
    %65 = vector.extract_strided_slice %37 {offsets = [0, 40], sizes = [8, 8], strides = [1, 1]} : vector<8x96xf32> to vector<8x8xf32>
    %66 = vector.extract_strided_slice %37 {offsets = [0, 72], sizes = [8, 8], strides = [1, 1]} : vector<8x96xf32> to vector<8x8xf32>
    %cst_25 = arith.constant dense<0.000000e+00> : vector<8x8xf32>
    %67 = tpu.matmul %64, %65, %cst_25 {dimension_numbers = #tpu.dot_dimension_numbers<[1], [1], [0], [0], [0, 0, 1, 0], [], []>} : vector<8x8xf32>, vector<8x8xf32>, vector<8x8xf32> -> vector<8x8xf32>
    %cst_26 = arith.constant 0xFF800000 : f32
    %68 = vector.broadcast %cst_26 : f32 to vector<8x8xf32>
    %69 = arith.select %14, %68, %67 : vector<8x8xi1>, vector<8x8xf32>
    %cst_27 = arith.constant dense<0xFF800000> : vector<8xf32>
    %70 = vector.multi_reduction <maximumf>, %69, %cst_27 [1] : vector<8x8xf32> to vector<8xf32>
    %71 = vector.shape_cast %70 : vector<8xf32> to vector<8x1xf32>
    %72 = vector.broadcast %71 : vector<8x1xf32> to vector<8x8xf32>
    %73 = arith.subf %69, %72 : vector<8x8xf32>
    %74 = math.exp %73 : vector<8x8xf32>
    %cst_28 = arith.constant dense<0.000000e+00> : vector<8xf32>
    %75 = vector.multi_reduction <add>, %74, %cst_28 [1] : vector<8x8xf32> to vector<8xf32>
    %76 = vector.shape_cast %75 : vector<8xf32> to vector<8x1xf32>
    %77 = vector.broadcast %76 : vector<8x1xf32> to vector<8x8xf32>
    %78 = arith.divf %74, %77 : vector<8x8xf32>
    %cst_29 = arith.constant dense<0.000000e+00> : vector<8x8xf32>
    %79 = tpu.matmul %78, %66, %cst_29 {dimension_numbers = #tpu.dot_dimension_numbers<[1], [0], [0], [1], [0, 0, 1, 1], [], []>} : vector<8x8xf32>, vector<8x8xf32>, vector<8x8xf32> -> vector<8x8xf32>
    %80 = vector.extract_strided_slice %39 {offsets = [8, 0], sizes = [8, 32], strides = [1, 1]} : vector<32x32xf32> to vector<8x32xf32>
    %cst_30 = arith.constant dense<0.000000e+00> : vector<8x32xf32>
    %81 = tpu.matmul %79, %80, %cst_30 {dimension_numbers = #tpu.dot_dimension_numbers<[1], [0], [0], [1], [0, 0, 1, 1], [], []>} : vector<8x8xf32>, vector<8x32xf32>, vector<8x32xf32> -> vector<8x32xf32>
    %82 = arith.addf %61, %81 : vector<8x32xf32>
    %83 = vector.extract_strided_slice %37 {offsets = [0, 16], sizes = [8, 8], strides = [1, 1]} : vector<8x96xf32> to vector<8x8xf32>
    %cst_31 = arith.constant 0.353553385 : f32
    %84 = vector.broadcast %cst_31 : f32 to vector<8x8xf32>
    %85 = arith.mulf %83, %84 : vector<8x8xf32>
    %86 = vector.extract_strided_slice %37 {offsets = [0, 48], sizes = [8, 8], strides = [1, 1]} : vector<8x96xf32> to vector<8x8xf32>
    %87 = vector.extract_strided_slice %37 {offsets = [0, 80], sizes = [8, 8], strides = [1, 1]} : vector<8x96xf32> to vector<8x8xf32>
    %cst_32 = arith.constant dense<0.000000e+00> : vector<8x8xf32>
    %88 = tpu.matmul %85, %86, %cst_32 {dimension_numbers = #tpu.dot_dimension_numbers<[1], [1], [0], [0], [0, 0, 1, 0], [], []>} : vector<8x8xf32>, vector<8x8xf32>, vector<8x8xf32> -> vector<8x8xf32>
    %cst_33 = arith.constant 0xFF800000 : f32
    %89 = vector.broadcast %cst_33 : f32 to vector<8x8xf32>
    %90 = arith.select %14, %89, %88 : vector<8x8xi1>, vector<8x8xf32>
    %cst_34 = arith.constant dense<0xFF800000> : vector<8xf32>
    %91 = vector.multi_reduction <maximumf>, %90, %cst_34 [1] : vector<8x8xf32> to vector<8xf32>
    %92 = vector.shape_cast %91 : vector<8xf32> to vector<8x1xf32>
    %93 = vector.broadcast %92 : vector<8x1xf32> to vector<8x8xf32>
    %94 = arith.subf %90, %93 : vector<8x8xf32>
    %95 = math.exp %94 : vector<8x8xf32>
    %cst_35 = arith.constant dense<0.000000e+00> : vector<8xf32>
    %96 = vector.multi_reduction <add>, %95, %cst_35 [1] : vector<8x8xf32> to vector<8xf32>
    %97 = vector.shape_cast %96 : vector<8xf32> to vector<8x1xf32>
    %98 = vector.broadcast %97 : vector<8x1xf32> to vector<8x8xf32>
    %99 = arith.divf %95, %98 : vector<8x8xf32>
    %cst_36 = arith.constant dense<0.000000e+00> : vector<8x8xf32>
    %100 = tpu.matmul %99, %87, %cst_36 {dimension_numbers = #tpu.dot_dimension_numbers<[1], [0], [0], [1], [0, 0, 1, 1], [], []>} : vector<8x8xf32>, vector<8x8xf32>, vector<8x8xf32> -> vector<8x8xf32>
    %101 = vector.extract_strided_slice %39 {offsets = [16, 0], sizes = [8, 32], strides = [1, 1]} : vector<32x32xf32> to vector<8x32xf32>
    %cst_37 = arith.constant dense<0.000000e+00> : vector<8x32xf32>
    %102 = tpu.matmul %100, %101, %cst_37 {dimension_numbers = #tpu.dot_dimension_numbers<[1], [0], [0], [1], [0, 0, 1, 1], [], []>} : vector<8x8xf32>, vector<8x32xf32>, vector<8x32xf32> -> vector<8x32xf32>
    %103 = arith.addf %82, %102 : vector<8x32xf32>
    %104 = vector.extract_strided_slice %37 {offsets = [0, 24], sizes = [8, 8], strides = [1, 1]} : vector<8x96xf32> to vector<8x8xf32>
    %cst_38 = arith.constant 0.353553385 : f32
    %105 = vector.broadcast %cst_38 : f32 to vector<8x8xf32>
    %106 = arith.mulf %104, %105 : vector<8x8xf32>
    %107 = vector.extract_strided_slice %37 {offsets = [0, 56], sizes = [8, 8], strides = [1, 1]} : vector<8x96xf32> to vector<8x8xf32>
    %108 = vector.extract_strided_slice %37 {offsets = [0, 88], sizes = [8, 8], strides = [1, 1]} : vector<8x96xf32> to vector<8x8xf32>
    %cst_39 = arith.constant dense<0.000000e+00> : vector<8x8xf32>
    %109 = tpu.matmul %106, %107, %cst_39 {dimension_numbers = #tpu.dot_dimension_numbers<[1], [1], [0], [0], [0, 0, 1, 0], [], []>} : vector<8x8xf32>, vector<8x8xf32>, vector<8x8xf32> -> vector<8x8xf32>
    %cst_40 = arith.constant 0xFF800000 : f32
    %110 = vector.broadcast %cst_40 : f32 to vector<8x8xf32>
    %111 = arith.select %14, %110, %109 : vector<8x8xi1>, vector<8x8xf32>
    %cst_41 = arith.constant dense<0xFF800000> : vector<8xf32>
    %112 = vector.multi_reduction <maximumf>, %111, %cst_41 [1] : vector<8x8xf32> to vector<8xf32>
    %113 = vector.shape_cast %112 : vector<8xf32> to vector<8x1xf32>
    %114 = vector.broadcast %113 : vector<8x1xf32> to vector<8x8xf32>
    %115 = arith.subf %111, %114 : vector<8x8xf32>
    %116 = math.exp %115 : vector<8x8xf32>
    %cst_42 = arith.constant dense<0.000000e+00> : vector<8xf32>
    %117 = vector.multi_reduction <add>, %116, %cst_42 [1] : vector<8x8xf32> to vector<8xf32>
    %118 = vector.shape_cast %117 : vector<8xf32> to vector<8x1xf32>
    %119 = vector.broadcast %118 : vector<8x1xf32> to vector<8x8xf32>
    %120 = arith.divf %116, %119 : vector<8x8xf32>
    %cst_43 = arith.constant dense<0.000000e+00> : vector<8x8xf32>
    %121 = tpu.matmul %120, %108, %cst_43 {dimension_numbers = #tpu.dot_dimension_numbers<[1], [0], [0], [1], [0, 0, 1, 1], [], []>} : vector<8x8xf32>, vector<8x8xf32>, vector<8x8xf32> -> vector<8x8xf32>
    %122 = vector.extract_strided_slice %39 {offsets = [24, 0], sizes = [8, 32], strides = [1, 1]} : vector<32x32xf32> to vector<8x32xf32>
    %cst_44 = arith.constant dense<0.000000e+00> : vector<8x32xf32>
    %123 = tpu.matmul %121, %122, %cst_44 {dimension_numbers = #tpu.dot_dimension_numbers<[1], [0], [0], [1], [0, 0, 1, 1], [], []>} : vector<8x8xf32>, vector<8x32xf32>, vector<8x32xf32> -> vector<8x32xf32>
    %124 = arith.addf %103, %123 : vector<8x32xf32>
    %125 = arith.addf %3, %124 : vector<8x32xf32>
    %126 = vector.broadcast %10 : vector<1x32xf32> to vector<8x32xf32>
    %127 = arith.addf %125, %126 : vector<8x32xf32>
    %cst_45 = arith.constant dense<0.000000e+00> : vector<8xf32>
    %128 = vector.multi_reduction <add>, %127, %cst_45 [1] : vector<8x32xf32> to vector<8xf32>
    %129 = vector.shape_cast %128 : vector<8xf32> to vector<8x1xf32>
    %cst_46 = arith.constant 3.200000e+01 : f32
    %130 = vector.broadcast %cst_46 : f32 to vector<8x1xf32>
    %131 = arith.divf %129, %130 : vector<8x1xf32>
    %132 = vector.broadcast %131 : vector<8x1xf32> to vector<8x32xf32>
    %133 = arith.subf %127, %132 : vector<8x32xf32>
    %134 = arith.mulf %133, %133 : vector<8x32xf32>
    %cst_47 = arith.constant dense<0.000000e+00> : vector<8xf32>
    %135 = vector.multi_reduction <add>, %134, %cst_47 [1] : vector<8x32xf32> to vector<8xf32>
    %136 = vector.shape_cast %135 : vector<8xf32> to vector<8x1xf32>
    %cst_48 = arith.constant 0.0322580636 : f32
    %137 = vector.broadcast %cst_48 : f32 to vector<8x1xf32>
    %138 = arith.mulf %136, %137 : vector<8x1xf32>
    %cst_49 = arith.constant 9.99999974E-6 : f32
    %139 = vector.broadcast %cst_49 : f32 to vector<8x1xf32>
    %140 = arith.addf %138, %139 : vector<8x1xf32>
    %141 = math.rsqrt %140 : vector<8x1xf32>
    %142 = vector.broadcast %141 : vector<8x1xf32> to vector<8x32xf32>
    %143 = arith.mulf %133, %142 : vector<8x32xf32>
    %144 = vector.broadcast %8 : vector<1x32xf32> to vector<8x32xf32>
    %145 = arith.mulf %144, %143 : vector<8x32xf32>
    %146 = vector.broadcast %9 : vector<1x32xf32> to vector<8x32xf32>
    %147 = arith.addf %145, %146 : vector<8x32xf32>
    %c0_50 = arith.constant 0 : index
    %c0_51 = arith.constant 0 : index
    %c0_52 = arith.constant 0 : index
    %148 = vector.load %arg8[%c0_50, %c0_51, %c0_52] : memref<1x32x128xf32, #tpu.memory_space<vmem>>, vector<1x32x128xf32>
    %149 = vector.shape_cast %148 : vector<1x32x128xf32> to vector<32x128xf32>
    %cst_53 = arith.constant dense<0.000000e+00> : vector<8x128xf32>
    %150 = tpu.matmul %147, %149, %cst_53 {dimension_numbers = #tpu.dot_dimension_numbers<[1], [0], [0], [1], [0, 0, 1, 1], [], []>} : vector<8x32xf32>, vector<32x128xf32>, vector<8x128xf32> -> vector<8x128xf32>
    %c0_54 = arith.constant 0 : index
    %c0_55 = arith.constant 0 : index
    %c0_56 = arith.constant 0 : index
    %151 = vector.load %arg9[%c0_54, %c0_55, %c0_56] : memref<1x1x128xf32, #tpu.memory_space<vmem>>, vector<1x1x128xf32>
    %152 = vector.shape_cast %151 : vector<1x1x128xf32> to vector<1x128xf32>
    %153 = vector.broadcast %152 : vector<1x128xf32> to vector<8x128xf32>
    %154 = arith.addf %150, %153 : vector<8x128xf32>
    %cst_57 = arith.constant 5.000000e-01 : f32
    %155 = vector.broadcast %cst_57 : f32 to vector<8x128xf32>
    %156 = arith.mulf %155, %154 : vector<8x128xf32>
    %cst_58 = arith.constant 4.471500e-02 : f32
    %157 = vector.broadcast %cst_58 : f32 to vector<8x128xf32>
    %158 = arith.mulf %157, %154 : vector<8x128xf32>
    %159 = arith.mulf %158, %154 : vector<8x128xf32>
    %160 = arith.mulf %159, %154 : vector<8x128xf32>
    %161 = arith.addf %154, %160 : vector<8x128xf32>
    %cst_59 = arith.constant 0.797884583 : f32
    %162 = vector.broadcast %cst_59 : f32 to vector<8x128xf32>
    %163 = arith.mulf %162, %161 : vector<8x128xf32>
    %164 = math.tanh %163 : vector<8x128xf32>
    %cst_60 = arith.constant 1.000000e+00 : f32
    %165 = vector.broadcast %cst_60 : f32 to vector<8x128xf32>
    %166 = arith.addf %165, %164 : vector<8x128xf32>
    %167 = arith.mulf %156, %166 : vector<8x128xf32>
    %c0_61 = arith.constant 0 : index
    %c0_62 = arith.constant 0 : index
    %c0_63 = arith.constant 0 : index
    %168 = vector.load %arg10[%c0_61, %c0_62, %c0_63] : memref<1x128x32xf32, #tpu.memory_space<vmem>>, vector<1x128x32xf32>
    %169 = vector.shape_cast %168 : vector<1x128x32xf32> to vector<128x32xf32>
    %cst_64 = arith.constant dense<0.000000e+00> : vector<8x32xf32>
    %170 = tpu.matmul %167, %169, %cst_64 {dimension_numbers = #tpu.dot_dimension_numbers<[1], [0], [0], [1], [0, 0, 1, 1], [], []>} : vector<8x128xf32>, vector<128x32xf32>, vector<8x32xf32> -> vector<8x32xf32>
    %171 = vector.broadcast %11 : vector<1x32xf32> to vector<8x32xf32>
    %172 = arith.addf %170, %171 : vector<8x32xf32>
    %173 = arith.addf %127, %172 : vector<8x32xf32>
    %c0_65 = arith.constant 0 : index
    %c0_66 = arith.constant 0 : index
    %174 = vector.load %arg16[%c0_65, %c0_66] : memref<8x32xf32, #tpu.memory_space<vmem>>, vector<8x32xf32>
    tpu.vector_store %arg16[%c0_65, %c0_66], %173 {strides = array<i32>} : memref<8x32xf32, #tpu.memory_space<vmem>>, vector<8x32xf32>,
    %c1_i32 = arith.constant 1 : i32
    %175 = arith.cmpi eq, %arg1, %c1_i32 : i32
    %176 = arith.extui %175 : i1 to i32
    %c0_i32_67 = arith.constant 0 : i32
    %177 = arith.cmpi ne, %176, %c0_i32_67 : i32
    scf.if %177 {
      %c0_68 = arith.constant 0 : index
      %c0_69 = arith.constant 0 : index
      %178 = vector.load %arg11[%c0_68, %c0_69] : memref<1x32xf32, #tpu.memory_space<vmem>>, vector<1x32xf32>
      %c0_70 = arith.constant 0 : index
      %c0_71 = arith.constant 0 : index
      %179 = vector.load %arg12[%c0_70, %c0_71] : memref<1x32xf32, #tpu.memory_space<vmem>>, vector<1x32xf32>
      %cst_72 = arith.constant dense<0.000000e+00> : vector<8xf32>
      %180 = vector.multi_reduction <add>, %173, %cst_72 [1] : vector<8x32xf32> to vector<8xf32>
      %181 = vector.shape_cast %180 : vector<8xf32> to vector<8x1xf32>
      %cst_73 = arith.constant 3.200000e+01 : f32
      %182 = vector.broadcast %cst_73 : f32 to vector<8x1xf32>
      %183 = arith.divf %181, %182 : vector<8x1xf32>
      %184 = vector.broadcast %183 : vector<8x1xf32> to vector<8x32xf32>
      %185 = arith.subf %173, %184 : vector<8x32xf32>
      %186 = arith.mulf %185, %185 : vector<8x32xf32>
      %cst_74 = arith.constant dense<0.000000e+00> : vector<8xf32>
      %187 = vector.multi_reduction <add>, %186, %cst_74 [1] : vector<8x32xf32> to vector<8xf32>
      %188 = vector.shape_cast %187 : vector<8xf32> to vector<8x1xf32>
      %cst_75 = arith.constant 0.0322580636 : f32
      %189 = vector.broadcast %cst_75 : f32 to vector<8x1xf32>
      %190 = arith.mulf %188, %189 : vector<8x1xf32>
      %cst_76 = arith.constant 9.99999974E-6 : f32
      %191 = vector.broadcast %cst_76 : f32 to vector<8x1xf32>
      %192 = arith.addf %190, %191 : vector<8x1xf32>
      %193 = math.rsqrt %192 : vector<8x1xf32>
      %194 = vector.broadcast %193 : vector<8x1xf32> to vector<8x32xf32>
      %195 = arith.mulf %185, %194 : vector<8x32xf32>
      %196 = vector.broadcast %178 : vector<1x32xf32> to vector<8x32xf32>
      %197 = arith.mulf %196, %195 : vector<8x32xf32>
      %198 = vector.broadcast %179 : vector<1x32xf32> to vector<8x32xf32>
      %199 = arith.addf %197, %198 : vector<8x32xf32>
      %c0_77 = arith.constant 0 : index
      %c0_78 = arith.constant 0 : index
      %200 = vector.load %arg13[%c0_77, %c0_78] : memref<32x128xf32, #tpu.memory_space<vmem>>, vector<32x128xf32>
      %cst_79 = arith.constant dense<0.000000e+00> : vector<8x128xf32>
      %201 = tpu.matmul %199, %200, %cst_79 {dimension_numbers = #tpu.dot_dimension_numbers<[1], [0], [0], [1], [0, 0, 1, 1], [], []>} : vector<8x32xf32>, vector<32x128xf32>, vector<8x128xf32> -> vector<8x128xf32>
      %c0_80 = arith.constant 0 : index
      %c0_81 = arith.constant 0 : index
      %202 = vector.load %arg14[%c0_80, %c0_81] : memref<1x128xf32, #tpu.memory_space<vmem>>, vector<1x128xf32>
      %203 = vector.broadcast %202 : vector<1x128xf32> to vector<8x128xf32>
      %204 = arith.addf %201, %203 : vector<8x128xf32>
      %c0_82 = arith.constant 0 : index
      %c0_83 = arith.constant 0 : index
      %c0_84 = arith.constant 0 : index
      %205 = vector.load %arg15[%c0_82, %c0_83, %c0_84] : memref<1x8x128xf32, #tpu.memory_space<vmem>>, vector<1x8x128xf32>
      %206 = vector.shape_cast %205 : vector<1x8x128xf32> to vector<8x128xf32>
      %207 = vector.shape_cast %204 : vector<8x128xf32> to vector<1x8x128xf32>
      tpu.vector_store %arg15[%c0_82, %c0_83, %c0_84], %207 {strides = array<i32>} : memref<1x8x128xf32, #tpu.memory_space<vmem>>, vector<1x8x128xf32>,
    } else {
    }
    return
  }
  func.func @transform_0(%arg0: i32, %arg1: i32) -> (i32, i32, i32) {
    %c0_i32 = arith.constant 0 : i32
    %c0_i32_0 = arith.constant 0 : i32
    %c0_i32_1 = arith.constant 0 : i32
    return %arg0, %c0_i32, %c0_i32_0 : i32, i32, i32
  }
  func.func @transform_1(%arg0: i32, %arg1: i32) -> (i32, i32) {
    %c0_i32 = arith.constant 0 : i32
    %c0_i32_0 = arith.constant 0 : i32
    %c0_i32_1 = arith.constant 0 : i32
    return %c0_i32, %c0_i32_0 : i32, i32
  }
  func.func @transform_2(%arg0: i32, %arg1: i32) -> (i32, i32) {
    %c0_i32 = arith.constant 0 : i32
    %c0_i32_0 = arith.constant 0 : i32
    %c0_i32_1 = arith.constant 0 : i32
    return %c0_i32, %c0_i32_0 : i32, i32
  }
  func.func @transform_3(%arg0: i32, %arg1: i32) -> (i32, i32, i32) {
    %c0_i32 = arith.constant 0 : i32
    %c0_i32_0 = arith.constant 0 : i32
    %c0_i32_1 = arith.constant 0 : i32
    return %arg1, %c0_i32, %c0_i32_0 : i32, i32, i32
  }
  func.func @transform_4(%arg0: i32, %arg1: i32) -> (i32, i32, i32) {
    %c0_i32 = arith.constant 0 : i32
    %c0_i32_0 = arith.constant 0 : i32
    %c0_i32_1 = arith.constant 0 : i32
    return %arg1, %c0_i32, %c0_i32_0 : i32, i32, i32
  }
  func.func @transform_5(%arg0: i32, %arg1: i32) -> (i32, i32, i32) {
    %c0_i32 = arith.constant 0 : i32
    %c0_i32_0 = arith.constant 0 : i32
    %c0_i32_1 = arith.constant 0 : i32
    return %arg1, %c0_i32, %c0_i32_0 : i32, i32, i32
  }
  func.func @transform_6(%arg0: i32, %arg1: i32) -> (i32, i32, i32) {
    %c0_i32 = arith.constant 0 : i32
    %c0_i32_0 = arith.constant 0 : i32
    %c0_i32_1 = arith.constant 0 : i32
    return %arg1, %c0_i32, %c0_i32_0 : i32, i32, i32
  }
  func.func @transform_7(%arg0: i32, %arg1: i32) -> (i32, i32, i32) {
    %c0_i32 = arith.constant 0 : i32
    %c0_i32_0 = arith.constant 0 : i32
    %c0_i32_1 = arith.constant 0 : i32
    return %arg1, %c0_i32, %c0_i32_0 : i32, i32, i32
  }
  func.func @transform_8(%arg0: i32, %arg1: i32) -> (i32, i32, i32) {
    %c0_i32 = arith.constant 0 : i32
    %c0_i32_0 = arith.constant 0 : i32
    %c0_i32_1 = arith.constant 0 : i32
    return %arg1, %c0_i32, %c0_i32_0 : i32, i32, i32
  }
  func.func @transform_9(%arg0: i32, %arg1: i32) -> (i32, i32) {
    %c0_i32 = arith.constant 0 : i32
    %c0_i32_0 = arith.constant 0 : i32
    %c0_i32_1 = arith.constant 0 : i32
    return %c0_i32, %c0_i32_0 : i32, i32
  }
  func.func @transform_10(%arg0: i32, %arg1: i32) -> (i32, i32) {
    %c0_i32 = arith.constant 0 : i32
    %c0_i32_0 = arith.constant 0 : i32
    %c0_i32_1 = arith.constant 0 : i32
    return %c0_i32, %c0_i32_0 : i32, i32
  }
  func.func @transform_11(%arg0: i32, %arg1: i32) -> (i32, i32) {
    %c0_i32 = arith.constant 0 : i32
    %c0_i32_0 = arith.constant 0 : i32
    %c0_i32_1 = arith.constant 0 : i32
    return %c0_i32, %c0_i32_0 : i32, i32
  }
  func.func @transform_12(%arg0: i32, %arg1: i32) -> (i32, i32) {
    %c0_i32 = arith.constant 0 : i32
    %c0_i32_0 = arith.constant 0 : i32
    %c0_i32_1 = arith.constant 0 : i32
    return %c0_i32, %c0_i32_0 : i32, i32
  }
  func.func @transform_13(%arg0: i32, %arg1: i32) -> (i32, i32, i32) {
    %c0_i32 = arith.constant 0 : i32
    %c0_i32_0 = arith.constant 0 : i32
    %c0_i32_1 = arith.constant 0 : i32
    return %arg0, %c0_i32, %c0_i32_0 : i32, i32, i32
  }
}

</mosaic_0001>

<bundles_post_ra>
// kernel: gpt_forward.1
= control target key start
LH: loop header
LB: loop body
LE: loop exit
PB: predicated region body
PF: predicated region fallthrough
CT: control target
= control target key end

     0   :  { %s3241_s0 = inlined_call_operand.vmem [shape: s32[2,8,1], index: 0, kind: input, shape index: {}]   ;;  %s3242_s1 = inlined_call_operand.vmem [shape: f32[128,32], index: 1, kind: input, shape index: {}]   ;;  %s3243_s2 = inlined_call_operand.vmem [shape: f32[8,32], index: 2, kind: input, shape index: {}]   ;;  %s3244_s3 = inlined_call_operand.vmem [shape: f32[2,6,32], index: 3, kind: input, shape index: {}]   ;;  %s3245_s4 = inlined_call_operand.vmem [shape: f32[2,32,96], index: 4, kind: input, shape index: {}]   ;;  %s3246_s5 = inlined_call_operand.vmem [shape: f32[2,32,32], index: 5, kind: input, shape index: {}]   ;;  %s3247_s6 = inlined_call_operand.vmem [shape: f32[2,32,128], index: 6, kind: input, shape index: {}]   ;;  %s3248_s7 = inlined_call_operand.vmem [shape: f32[2,1,128], index: 7, kind: input, shape index: {}]   ;;  %s3249_s8 = inlined_call_operand.vmem [shape: f32[2,128,32], index: 8, kind: input, shape index: {}]   ;;  %s3250_s9 = inlined_call_operand.vmem [shape: f32[1,32], index: 9, kind: input, shape index: {}]   ;;  %s3251_s10 = inlined_call_operand.vmem [shape: f32[1,32], index: 10, kind: input, shape index: {}]   ;;  %s3252_s11 = inlined_call_operand.vmem [shape: f32[32,128], index: 11, kind: input, shape index: {}]   ;;  %s3253_s12 = inlined_call_operand.vmem [shape: f32[1,128], index: 12, kind: input, shape index: {}]   ;;  %s3254_s13 = inlined_call_operand.hbm [shape: f32[2,8,128], index: 13, kind: output, shape index: {}]  }
   0x1   :  { %3269 = sst [smem:[#allocation18_spill]] %s3241_s0 }
   0x2   :  { %3270 = sst [smem:[#allocation19_spill]] %s3244_s3 }
   0x3   :  { %3271 = sst [smem:[#allocation20_spill]] %s3253_s12 }
   0x4   :  { %3272 = sst [smem:[#allocation21_spill]] %s3254_s13 }
   0x5   :  { %18 = vsyncpa [#allocation4], 0 }
   0x6   :  { %20 = vsyncpa [#allocation4 + $0x1], 0  ;;  %s2805_s25 = smov 0   ;;  %s2807_s26 = smov 0  }
   0x7   :  { %s2809_s27 = smov 0   ;;  %s2811_s28 = smov 0  }
   0x8   :  { %s2813_s29 = smov 0   ;;  %s2815_s30 = smov 0  }
   0x9   :  { %s2817_s14 = smov 0   ;;  %s2819_s15 = smov 0  }
   0xa LB: > { %3273 = sst [smem:[#allocation6_spill]] %s2685_s25  ;;  %s2219_s16 = sadd.s32 4294967295, %s2713_s15   ;;  %s2713_s15 = sphi %s2819_s15, %s26_s15   ;;  %s2709_s14 = sphi %s2817_s14, %s3304_s14   ;;  %s2705_s30 = sphi %s2815_s30, %s3303_s30   ;;  %s2701_s29 = sphi %s2813_s29, %s3302_s29   ;;  %s2697_s28 = sphi %s2811_s28, %s3301_s28   ;;  %s2693_s27 = sphi %s2809_s27, %s3300_s27   ;;  %s2689_s26 = sphi %s2807_s26, %s3299_s26   ;;  %s2685_s25 = sphi %s2805_s25, %s3298_s25  }
   0xb   : > { %3274 = sst [smem:[#allocation7_spill]] %s2689_s26  ;;  %s2220_s17 = sadd.s32 4294967294, %s2713_s15  }
   0xc   : > { %3275 = sst [smem:[#allocation8_spill]] %s2693_s27  ;;  %s35_s18 = sadd.s32 1, %s2705_s30 }
   0xd   : > { %3276 = sst [smem:[#allocation9_spill]] %s2701_s29  ;;  %p36_p0 = scmp.ge.s32.totalorder %s35_s18, 2 }
   0xe   : > { %3277 = sst [smem:[#allocation10_spill]] %s2705_s30  ;;  %s38_s19 = sadd.s32 1, %s2709_s14 }
   0xf   : > { %3278 = sst [smem:[#allocation11_spill]] %s2709_s14  ;;  %p363_p1 = scmp.ne.s32.totalorder %s2693_s27, %s2689_s26 }
  0x10   : > { %3279 = sst [smem:[#allocation12_spill]] %s2713_s15  ;;  %p364_p2 = scmp.eq.s32.totalorder %s2219_s16, 3 }
  0x11   : > { %s3306_s18 = smov (%p36_p0, %s35_s18), 0  ;;  %s3308_s19 = smov (!%p36_p0, %s38_s19), %s2709_s14 }
  0x12   : > { %3280 = sst [smem:[#allocation13_spill]] %s3306_s18  ;;  %p2854_p3 = por %p364_p2, %p363_p1 }
  0x13   : > { %p369_p4 = scmp.ne.s32.totalorder %s2689_s26, %s2685_s25  ;;  %p40_p5 = scmp.ge.s32.totalorder %s3308_s19, 2 }
  0x14   : > { %s3281_s20 = scalar_select %p2854_p3, 1, 0 }
  0x15   : > { %p370_p6 = scmp.eq.s32.totalorder %s2220_s17, 3  ;;  %p2223_p7 = scmp.ge.s32.totalorder %s2713_s15, 1 }
  0x16   : > { %3282 = sst [smem:[#allocation14_spill]] %s3281_s20  ;;  %p458_p8 = scmp.lt.s32.totalorder %s2713_s15, 5 }
  0x17   : > { %s3310_s19 = smov (%p40_p5, %s3308_s19), 0  ;;  %p2864_p9 = por %p370_p6, %p369_p4 }
  0x18   : > { %3283 = sst [smem:[#allocation15_spill]] %s3310_s19  ;;  %p459_p10 = pnand %p2223_p7, %p458_p8 }
  0x19   : > { %s3284_s21 = scalar_select %p2864_p9, 1, 0 }
  0x1a   : > { %s350_s22 = ssub.s32 %s2709_s14, %s3310_s19  ;;  %s353_s23 = sadd.s32 1, %s2693_s27 }
  0x1b   : > { %3285 = sst [smem:[#allocation16_spill]] %s3284_s21  ;;  %p351_p11 = scmp.eq.s32.totalorder %s350_s22, 0 }
  0x1c   : > { %462 = sbr.rel (%p459_p10) target bundleno = 4875 (0x130b), region = 72  ;;  %s3260_s16 = sand.u32 (!%p459_p10), 1, %s2689_s26  }
  0x1d   : > { %s2872_s24 = scalar_select %p351_p11, %s2693_s27, %s353_s23  }
  0x1e   : > { %p528_p12 = scmp.lt.s32.totalorder (!%p459_p10), %s2701_s29, 1  ;;  %s2878_s17 = sshll.u32 (!%p459_p10), %s3260_s16, 3 }
  0x1f   : > { %3286 = sst [smem:[#allocation17_spill]] %s2872_s24  ;;  %p532_p13 = scmp.lt.s32.totalorder (!%p459_p10), %s2697_s28, 1 }
  0x20   : > { %s3287_s0 = sld [smem:[#allocation18_spill]] (!%p459_p10)  ;;  %s527_s15 = scalar_lea.vmem (!%p459_p10), [#allocation3], %s2878_s17 }
  0x21   : > { %s529_s18 = scalar_select %p528_p12, %s2701_s29, 1 }
  0x22   : > { %s2883_s19 = scalar_select %p532_p13, %s2697_s28, 1 }
  0x23   : > { %s2225_s22 = sshll.u32 %s529_s18, 3  ;;  %s3288_s3 = sld [smem:[#allocation19_spill]] }
  0x24   : > { %s2226_s24 = sshll.u32 %s2883_s19, 3  ;;  %s2266_s25 = sshll.u32 %s2883_s19, 5 }
  0x25   : > { %s2898_s20 = scalar_lea.vmem %s3245_s4, %s2266_s25  ;;  %s2903_s18 = scalar_lea.vmem %s3246_s5, %s2266_s25 }
  0x26   : > { %s531_s30 = scalar_lea.vmem %s3287_s0, %s2225_s22  ;;  %s2908_s22 = scalar_lea.vmem %s3247_s6, %s2266_s25 }
  0x27   : > { %s553_s21 = scalar_lea.vmem %s3248_s7, %s2883_s19  ;;  %p2235_p0 = scmp.ne.s32.totalorder %s2697_s28, 0 }
  0x29   : > { %s2892_s16 = scalar_lea.vmem %s3288_s3, %s2226_s24  ;;  %s2269_s24 = sshll.u32 %s2883_s19, 7 }
  0x2a   : > { %s2918_s13 = scalar_lea.vmem %s3249_s8, %s2269_s24  ;;  %562 = sbr.rel (%p2235_p0) target bundleno = 370 (0x172), region = 76 }
  0x2f   : > { %v563_v0 = vld [vmem:[%s531_s30] sm:$0xff]  ;;  %v587_v1 = vld [vmem:[%s3242_s1 + $0x78] sm:$0xff]  ;;  %v2715_v2 = vmov 0   ;;  %v2716_v3 = vmov 0.0   ;;  %v586_v4 = vld [vmem:[%s3242_s1 + $0x70] sm:$0xff]  ;;  %vm2717_vm0 = vmmov 0   ;;  %v564_v19 = vlaneseq }
  0x30   : > { %2596 = vset.pattern.permute.xlu0 %v2715_v2  ;;  %2343 = vmatprep.subr.mxu0 %v2716_v3  ;;  %v585_v5 = vld [vmem:[%s3242_s1 + $0x68] sm:$0xff]  ;;  %v584_v6 = vld [vmem:[%s3242_s1 + $0x60] sm:$0xff]  ;;  %v583_v7 = vld [vmem:[%s3242_s1 + $0x58] sm:$0xff]  ;;  %v2718_v22 = vmov 1.0   ;;  %vm659_vm2 = vcmask 261120  }
  0x31   : > { %567 = vperm.xlu0 %2596, %v563_v0   ;;  %2344 = vmatpush3.msra.mxu0 %v587_v1  ;;  %v582_v8 = vld [vmem:[%s3242_s1 + $0x50] sm:$0xff]  ;;  %v581_v9 = vld [vmem:[%s3242_s1 + $0x48] sm:$0xff]  ;;  %v580_v10 = vld [vmem:[%s3242_s1 + $0x40] sm:$0xff]  ;;  %v565_v20 = vand.u32 127, %v564_v19 }
  0x32   : > { %2345 = vmatprep.subr.mxu0 %v2716_v3  ;;  %2375 = vmatprep.mubr.msk.f32.mxu0 %vm2717_vm0, %v2716_v3  ;;  %v579_v11 = vld [vmem:[%s3242_s1 + $0x38] sm:$0xff]  ;;  %v578_v12 = vld [vmem:[%s3242_s1 + $0x30] sm:$0xff]  ;;  %v577_v13 = vld [vmem:[%s3242_s1 + $0x28] sm:$0xff] }
  0x33   : > { %2346 = vmatpush3.msra.mxu0 %v586_v4  ;;  %v576_v14 = vld [vmem:[%s3242_s1 + $0x20] sm:$0xff]  ;;  %v575_v15 = vld [vmem:[%s3242_s1 + $0x18] sm:$0xff]  ;;  %v574_v16 = vld [vmem:[%s3242_s1 + $0x10] sm:$0xff] }
  0x34   : > { %2347 = vmatprep.subr.mxu0 %v2716_v3  ;;  %v573_v17 = vld [vmem:[%s3242_s1 + $0x8] sm:$0xff]  ;;  %v572_v18 = vld [vmem:[%s3242_s1] sm:$0xff] }
  0x35   : > { %2348 = vmatpush3.msra.mxu0 %v585_v5  ;;  %v588_v23 = vld [vmem:[%s3243_s2] sm:$0xff] }
  0x36   : > { %2349 = vmatprep.subr.mxu0 %v2716_v3 }
  0x37   : > { %2350 = vmatpush3.msra.mxu0 %v584_v6 }
  0x38   : > { %2351 = vmatprep.subr.mxu0 %v2716_v3 }
  0x39   : > { %2352 = vmatpush3.msra.mxu0 %v583_v7 }
  0x3a   : > { %2353 = vmatprep.subr.mxu0 %v2716_v3 }
  0x3b   : > { %2354 = vmatpush3.msra.mxu0 %v582_v8 }
  0x3c   : > { %2355 = vmatprep.subr.mxu0 %v2716_v3 }
  0x3d   : > { %2356 = vmatpush3.msra.mxu0 %v581_v9 }
  0x3e   : > { %2357 = vmatprep.subr.mxu0 %v2716_v3 }
  0x3f   : > { %2358 = vmatpush3.msra.mxu0 %v580_v10 }
  0x40   : > { %2359 = vmatprep.subr.mxu0 %v2716_v3 }
  0x41   : > { %2360 = vmatpush3.msra.mxu0 %v579_v11 }
  0x42   : > { %2361 = vmatprep.subr.mxu0 %v2716_v3 }
  0x43   : > { %2362 = vmatpush3.msra.mxu0 %v578_v12 }
  0x44   : > { %2363 = vmatprep.subr.mxu0 %v2716_v3 }
  0x45   : > { %2364 = vmatpush3.msra.mxu0 %v577_v13 }
  0x46   : > { %2365 = vmatprep.subr.mxu0 %v2716_v3 }
  0x47   : > { %2366 = vmatpush3.msra.mxu0 %v576_v14 }
  0x48   : > { %2367 = vmatprep.subr.mxu0 %v2716_v3 }
  0x49   : > { %2368 = vmatpush3.msra.mxu0 %v575_v15 }
  0x4a   : > { %2369 = vmatprep.subr.mxu0 %v2716_v3 }
  0x4b   : > { %2370 = vmatpush3.msra.mxu0 %v574_v16 }
  0x4c   : > { %2371 = vmatprep.subr.mxu0 %v2716_v3 }
  0x4d   : > { %2372 = vmatpush3.msra.mxu0 %v573_v17 }
  0x4e   : > { %2373 = vmatprep.subr.mxu0 %v2716_v3 }
  0x4f   : > { %2374 = vmatpush3.msra.mxu0 %v572_v18 }
  0xac   : > { %v568_v21 = vpop.permute.xlu0 %567 }
  0xad   : > { %vm569_vm1 = vcmp.eq.s32.totalorder %v565_v20, %v568_v21 }
  0xae   : > { %2376 = vmatmul.mubr.msk.f32.vlgmr.msra.gmra.mxu0 %vm569_vm1, %v2718_v22 }
 0x16e   : > { %v655_v24 = vpop.f32.mrf.mxu0 }
 0x16f   : > { %v656_v25 = vadd.f32 %v655_v24, %v588_v23 }
 0x170   : > { %v2377_v26 = vpop.f32.mrf.mxu0 }
 0x171   : > { %660 = vst.msk [vmem:[#allocation2] sm:$0xff] %vm659_vm2, %v656_v25 }
 0x172 PF: > { %vm668_vm3 = vcmask 261120   ;;  %v696_v34 = vld [vmem:[%s2898_s20 + $0x18] sm:$0xff]  ;;  %v2719_v35 = vmov 0.0   ;;  %v695_v36 = vld [vmem:[%s2898_s20 + $0x10] sm:$0xff]  ;;  %vm2720_vm4 = vmmov 0   ;;  %v694_v37 = vld [vmem:[%s2898_s20 + $0x8] sm:$0xff]  ;;  %v663_v42 = vlaneseq }
 0x173   : > { %2378 = vmatprep.subr.mxu0 %v2719_v35  ;;  %2386 = vmatprep.mubr.msk.f32.mxu0 %vm2720_vm4, %v2719_v35  ;;  %v693_v38 = vld [vmem:[%s2898_s20] sm:$0xff]  ;;  %s2721_s20 = smov 64   ;;  %vm778_vm5 = vcmask 64512   ;;  %s2723_s29 = smov 88  }
 0x174   : > { %2379 = vmatpush3.msra.mxu0 %v696_v34  ;;  %2414 = vmatprep.subr.mxu1 %v2719_v35  ;;  %v2993_v43 = vshrl.u32 %v663_v42, 7  ;;  %v2997_v45 = vld [vmem:[%s2892_s16] sm:$0x3f]  ;;  %s2722_s16 = smov 96   ;;  %v3019_v58 = vand.u32 127, %v663_v42  ;;  %s2724_s12 = smov 120  }
 0x175   : > { %2380 = vmatprep.subr.mxu0 %v2719_v35  ;;  %2416 = vmatprep.mubr.msk.f32.mxu1 %vm2720_vm4, %v2719_v35  ;;  %v770_v9 = vld [vmem:[%s2903_s18] sm:$0xff]  ;;  %s2725_s25 = smov 56   ;;  %s2726_s0 = smov 80  }
 0x176   : > { %2381 = vmatpush3.msra.mxu0 %v695_v36  ;;  %v685_v44 = vsub.s32 0, %v2993_v43  ;;  %v690_v46 = vsub.s32 1, %v2993_v43  ;;  %vm667_vm6 = vcmp.gt.s32.totalorder %v3019_v58, %v2993_v43  ;;  %2415 = vmatpush3.msra.mxu1 %v770_v9  ;;  %s2727_s3 = smov 112   ;;  %s2728_s30 = smov 48  }
 0x177   : > { %2382 = vmatprep.subr.mxu0 %v2719_v35  ;;  %2424 = vmatprep.subr.mxu1 %v2719_v35  ;;  %s2729_s14 = smov 72   ;;  %s2730_s23 = smov 104  }
 0x178   : > { %v2973_v27 = vld [vmem:[#allocation2] sm:$0xff]  ;;  %2383 = vmatpush3.msra.mxu0 %v694_v37  ;;  %v686_v47 = vrot.slane %v2997_v45, %v685_v44  ;;  %v691_v50 = vrot.slane %v2997_v45, %v690_v46  ;;  %s2731_s27 = smov 40   ;;  %p2257_p1 = scmp.ne.s32.totalorder %s2697_s28, 1 }
 0x179   : > { %v669_v28 = vsel %vm668_vm3, %v2973_v27, 0.0  ;;  %2384 = vmatprep.subr.mxu0 %v2719_v35 }
 0x17a   : > { %670 = vadd.xlane.f32.xlu0 %v669_v28  ;;  %2385 = vmatpush3.msra.mxu0 %v693_v38 }
 0x17b   : > { %2389 = vmatprep.subr.mxu0 %v2719_v35 }
 0x203   : > { %v671_v29 = vpop.xlane.xlu0 %670 }
 0x204   : > { %v673_v30 = vmul.f32 0.03125, %v671_v29  ;;  %v771_v29 = vld [vmem:[%s2903_s18 + $0x8] sm:$0xff] }
 0x206   : > { %v674_v31 = vsub.f32 %v2973_v27, %v673_v30 }
 0x208   : > { %v675_v32 = vmul.f32 %v674_v31, %v674_v31 }
 0x20a   : > { %v676_v33 = vsel %vm668_vm3, %v675_v32, 0.0 }
 0x20b   : > { %677 = vadd.xlane.f32.xlu0 %v676_v33 }
 0x294   : > { %v678_v39 = vpop.xlane.xlu0 %677 }
 0x295   : > { %v679_v40 = vmul.f32 0.032258064, %v678_v39 }
 0x297   : > { %v680_v41 = vadd.f32 1e-05, %v679_v40 }
 0x299   : > { %2597 = vrsqrt.f32 %v680_v41 }
 0x2a6   : > { %v2598_v48 = vpop.eup %2597 }
 0x2a7   : > { %v682_v49 = vmul.f32 %v2598_v48, %v674_v31 }
 0x2a9   : > { %v687_v51 = vmul.f32 %v686_v47, %v682_v49 }
 0x2ab   : > { %v692_v52 = vadd.f32 %v691_v50, %v687_v51 }
 0x2ad   : > { %2387 = vmatmul.mubr.msk.f32.vlgmr.msra.gmra.mxu0 %vm668_vm3, %v692_v52 }
 0x2ae   : > { %2391 = vmatprep.mubr.msk.f32.mxu0 %vm2720_vm4, %v2719_v35 }
 0x36d   : > { %v3005_v53 = vpop.f32.mrf.mxu0 }
 0x36e   : > { %866 = vrot.lane.b32.xlu0 %v3005_v53, %s2721_s20  ;;  %776 = vrot.lane.b32.xlu1 %v3005_v53, %s2722_s16  ;;  %v3011_v56 = vmul.f32 0.35355338, %v3005_v53 }
 0x36f   : > { %v2388_v54 = vpop.f32.mrf.mxu0 }
 0x370   : > { %v772_v54 = vld [vmem:[%s2903_s18 + $0x10] sm:$0xff] }
 0x3e0   : > { %v777_v55 = vpop.permute.xlu1 %776  ;;  %v867_v57 = vpop.permute.xlu0 %866 }
 0x3e1   : > { %2390 = vmatpush3.xpose.msk.msra.mxu0 %vm778_vm5, %v777_v55 }
 0x3e2   : > { %2394 = vmatprep.subr.mxu0 %v2719_v35 }
 0x3e4   : > { %2392 = vmatmul.mubr.msk.f32.vlgmr.msra.gmra.mxu0 %vm778_vm5, %v3011_v56 }
 0x3e5   : > { %2395 = vmatpush3.msra.mxu0 %v867_v57  ;;  %2396 = vmatprep.mubr.msk.f32.mxu0 %vm2720_vm4, %v2719_v35 }
 0x3e6   : > { %2399 = vmatprep.subr.mxu0 %v2719_v35 }
 0x4a4   : > { %v850_v59 = vpop.f32.mrf.mxu0 }
 0x4a5   : > { %v854_v60 = vsel %vm667_vm6, -inf, %v850_v59 }
 0x4a6   : > { %v2393_v61 = vpop.f32.mrf.mxu0  ;;  %v855_v62 = vsel %vm778_vm5, %v854_v60, -inf }
 0x4a7   : > { %856 = vmax.xlane.f32.xlu1 %v855_v62 }
 0x530   : > { %v857_v63 = vpop.xlane.xlu1 %856 }
 0x531   : > { %v858_v0 = vsub.f32 %v854_v60, %v857_v63 }
 0x533   : > { %v859_v1 = vmul.f32 1.442695, %v858_v0 }
 0x535   : > { %2599 = vpow2.f32 %v859_v1 }
 0x542   : > { %v2600_v2 = vpop.eup %2599 }
 0x543   : > { %v861_v3 = vsel %vm778_vm5, %v2600_v2, 0.0 }
 0x544   : > { %862 = vadd.xlane.f32.xlu0 %v861_v3  ;;  %v773_v3 = vld [vmem:[%s2903_s18 + $0x18] sm:$0xff] }
 0x55a   : > { %944 = vrot.lane.b32.xlu0 %v3005_v53, %s2723_s29 }
 0x55e   : > { %942 = vrot.lane.b32.xlu0 %v3011_v56, %s2724_s12 }
 0x5cd   : > { %v863_v4 = vpop.xlane.xlu0 %862 }
 0x5ce   : > { %2601 = vrcp.f32 %v863_v4 }
 0x5d1   : > { %v945_v6 = vpop.permute.xlu0 %944 }
 0x5d5   : > { %v943_v8 = vpop.permute.xlu0 %942 }
 0x5db   : > { %v2602_v5 = vpop.eup %2601 }
 0x5dc   : > { %v865_v7 = vmul.f32 %v2602_v5, %v2600_v2 }
 0x5de   : > { %2397 = vmatmul.mubr.msk.f32.vlgmr.msra.gmra.mxu0 %vm778_vm5, %v865_v7 }
 0x5df   : > { %2400 = vmatpush3.xpose.msk.msra.mxu0 %vm778_vm5, %v945_v6  ;;  %2401 = vmatprep.mubr.msk.f32.mxu0 %vm2720_vm4, %v2719_v35 }
 0x5e0   : > { %2404 = vmatprep.subr.mxu0 %v2719_v35 }
 0x5e2   : > { %2402 = vmatmul.mubr.msk.f32.vlgmr.msra.gmra.mxu0 %vm778_vm5, %v943_v8 }
 0x5e3   : > { %2406 = vmatprep.mubr.msk.f32.mxu0 %vm2720_vm4, %v2719_v35 }
 0x69e   : > { %v938_v10 = vpop.f32.mrf.mxu0 }
 0x69f   : > { %2417 = vmatmul.mubr.msk.f32.vlgmr.msra.gmra.mxu1 %vm778_vm5, %v938_v10 }
 0x6a0   : > { %v2398_v11 = vpop.f32.mrf.mxu0  ;;  %2426 = vmatprep.mubr.msk.f32.mxu1 %vm2720_vm4, %v2719_v35 }
 0x6a2   : > { %v1016_v12 = vpop.f32.mrf.mxu0 }
 0x6a3   : > { %v1020_v13 = vsel %vm667_vm6, -inf, %v1016_v12  ;;  %v1737_v12 = vsub.s32 4, %v2993_v43 }
 0x6a4   : > { %v2403_v14 = vpop.f32.mrf.mxu0  ;;  %v1021_v15 = vsel %vm778_vm5, %v1020_v13, -inf }
 0x6a5   : > { %1022 = vmax.xlane.f32.xlu1 %v1021_v15  ;;  %v1738_v15 = vrot.slane %v2997_v45, %v1737_v12 }
 0x6b6   : > { %1032 = vrot.lane.b32.xlu1 %v3005_v53, %s2725_s25 }
 0x6ba   : > { %1256 = vrot.lane.b32.xlu1 %v3005_v53, %s2726_s0 }
 0x6be   : > { %1254 = vrot.lane.b32.xlu1 %v3011_v56, %s2727_s3 }
 0x72e   : > { %v1023_v16 = vpop.xlane.xlu1 %1022 }
 0x72f   : > { %v1024_v17 = vsub.f32 %v1020_v13, %v1023_v16 }
 0x731   : > { %v1025_v18 = vmul.f32 1.442695, %v1024_v17 }
 0x732   : > { %v1033_v19 = vpop.permute.xlu1 %1032 }
 0x733   : > { %2603 = vpow2.f32 %v1025_v18  ;;  %2405 = vmatpush3.msra.mxu0 %v1033_v19 }
 0x734   : > { %2409 = vmatprep.subr.mxu0 %v2719_v35 }
 0x736   : > { %v1257_v30 = vpop.permute.xlu1 %1256 }
 0x73a   : > { %v1255_v33 = vpop.permute.xlu1 %1254 }
 0x740   : > { %v2604_v20 = vpop.eup %2603 }
 0x741   : > { %v1027_v21 = vsel %vm778_vm5, %v2604_v20, 0.0 }
 0x742   : > { %1028 = vadd.xlane.f32.xlu0 %v1027_v21 }
 0x758   : > { %1344 = vrot.lane.b32.xlu0 %v3005_v53, %s2728_s30 }
 0x75f   : > { %v3053_v22 = vpop.f32.mrf.mxu1 }
 0x761   : > { %v2418_v23 = vpop.f32.mrf.mxu1 }
 0x7cb   : > { %v1029_v24 = vpop.xlane.xlu0 %1028 }
 0x7cc   : > { %2605 = vrcp.f32 %v1029_v24 }
 0x7cf   : > { %v1345_v25 = vpop.permute.xlu0 %1344 }
 0x7d0   : > { %2425 = vmatpush3.msra.mxu1 %v1345_v25  ;;  %v1766_v25 = vld [vmem:[%s2908_s22 + $0x18] sm:$0xff] }
 0x7d1   : > { %2434 = vmatprep.subr.mxu1 %v2719_v35 }
 0x7d9   : > { %v2606_v26 = vpop.eup %2605 }
 0x7da   : > { %v1031_v28 = vmul.f32 %v2606_v26, %v2604_v20  ;;  %v1765_v26 = vld [vmem:[%s2908_s22 + $0x10] sm:$0xff] }
 0x7dc   : > { %2407 = vmatmul.mubr.msk.f32.vlgmr.msra.gmra.mxu0 %vm778_vm5, %v1031_v28  ;;  %v1763_v28 = vld [vmem:[%s2908_s22] sm:$0xff] }
 0x7dd   : > { %2410 = vmatpush3.msra.mxu0 %v771_v29  ;;  %2411 = vmatprep.mubr.msk.f32.mxu0 %vm2720_vm4, %v2719_v35 }
 0x7de   : > { %2419 = vmatprep.subr.mxu0 %v2719_v35 }
 0x89c   : > { %v1104_v31 = vpop.f32.mrf.mxu0 }
 0x89d   : > { %2412 = vmatmul.mubr.msk.f32.vlgmr.msra.gmra.mxu0 %vm778_vm5, %v1104_v31 }
 0x89e   : > { %2420 = vmatpush3.xpose.msk.msra.mxu0 %vm778_vm5, %v1257_v30  ;;  %v2408_v32 = vpop.f32.mrf.mxu0  ;;  %2421 = vmatprep.mubr.msk.f32.mxu0 %vm2720_vm4, %v2719_v35 }
 0x89f   : > { %2429 = vmatprep.subr.mxu0 %v2719_v35  ;;  %v1755_v32 = vsub.s32 2, %v2993_v43 }
 0x8a1   : > { %2422 = vmatmul.mubr.msk.f32.vlgmr.msra.gmra.mxu0 %vm778_vm5, %v1255_v33  ;;  %v1760_v33 = vsub.s32 3, %v2993_v43 }
 0x8a2   : > { %2431 = vmatprep.mubr.msk.f32.mxu0 %vm2720_vm4, %v2719_v35  ;;  %2430 = vmatpush3.msra.mxu0 %v772_v54  ;;  %v1861_v54 = vld [vmem:[%s2918_s13 + $0x28] sm:$0xff] }
 0x8a3   : > { %2439 = vmatprep.subr.mxu0 %v2719_v35 }
 0x95d   : > { %v1177_v34 = vpop.f32.mrf.mxu0 }
 0x95e   : > { %v1251_v4 = vadd.f32 %v3053_v22, %v1177_v34  ;;  %v1756_v34 = vrot.slane %v2997_v45, %v1755_v32 }
 0x95f   : > { %v2413_v36 = vpop.f32.mrf.mxu0 }
 0x961   : > { %v1328_v37 = vpop.f32.mrf.mxu0 }
 0x962   : > { %v1332_v38 = vsel %vm667_vm6, -inf, %v1328_v37 }
 0x963   : > { %v2423_v39 = vpop.f32.mrf.mxu0  ;;  %v1333_v40 = vsel %vm778_vm5, %v1332_v38, -inf }
 0x964   : > { %1334 = vmax.xlane.f32.xlu1 %v1333_v40 }
 0x9ed   : > { %v1335_v41 = vpop.xlane.xlu1 %1334 }
 0x9ee   : > { %v1336_v42 = vsub.f32 %v1332_v38, %v1335_v41  ;;  %v1761_v38 = vrot.slane %v2997_v45, %v1760_v33  ;;  %v1871_v41 = vld [vmem:[%s2918_s13 + $0x78] sm:$0xff] }
 0x9f0   : > { %v1337_v44 = vmul.f32 1.442695, %v1336_v42  ;;  %v1870_v42 = vld [vmem:[%s2918_s13 + $0x70] sm:$0xff] }
 0x9f2   : > { %2607 = vpow2.f32 %v1337_v44  ;;  %v1869_v44 = vld [vmem:[%s2918_s13 + $0x68] sm:$0xff] }
 0x9ff   : > { %v2608_v46 = vpop.eup %2607 }
 0xa00   : > { %v1339_v47 = vsel %vm778_vm5, %v2608_v46, 0.0 }
 0xa01   : > { %1340 = vadd.xlane.f32.xlu0 %v1339_v47  ;;  %v1867_v47 = vld [vmem:[%s2918_s13 + $0x58] sm:$0xff] }
 0xa17   : > { %1496 = vrot.lane.b32.xlu0 %v3005_v53, %s2729_s14  ;;  %s3289_s14 = sld [smem:[#allocation20_spill]] (!%p2257_p1) }
 0xa1b   : > { %1494 = vrot.lane.b32.xlu0 %v3011_v56, %s2730_s23 }
 0xa8a   : > { %v1341_v48 = vpop.xlane.xlu0 %1340 }
 0xa8b   : > { %2609 = vrcp.f32 %v1341_v48  ;;  %v1866_v48 = vld [vmem:[%s2918_s13 + $0x50] sm:$0xff] }
 0xa8e   : > { %v1497_v50 = vpop.permute.xlu0 %1496 }
 0xa92   : > { %v1495_v52 = vpop.permute.xlu0 %1494 }
 0xa98   : > { %v2610_v49 = vpop.eup %2609 }
 0xa99   : > { %v1343_v51 = vmul.f32 %v2610_v49, %v2608_v46  ;;  %v1868_v46 = vld [vmem:[%s2918_s13 + $0x60] sm:$0xff]  ;;  %v1865_v49 = vld [vmem:[%s2918_s13 + $0x48] sm:$0xff] }
 0xa9b   : > { %2427 = vmatmul.mubr.msk.f32.vlgmr.msra.gmra.mxu1 %vm778_vm5, %v1343_v51  ;;  %v1863_v51 = vld [vmem:[%s2918_s13 + $0x38] sm:$0xff] }
 0xa9c   : > { %2435 = vmatpush3.xpose.msk.msra.mxu1 %vm778_vm5, %v1497_v50  ;;  %2436 = vmatprep.mubr.msk.f32.mxu1 %vm2720_vm4, %v2719_v35  ;;  %v1864_v50 = vld [vmem:[%s2918_s13 + $0x40] sm:$0xff] }
 0xa9d   : > { %2444 = vmatprep.subr.mxu1 %v2719_v35 }
 0xa9f   : > { %2437 = vmatmul.mubr.msk.f32.vlgmr.msra.gmra.mxu1 %vm778_vm5, %v1495_v52  ;;  %v1862_v52 = vld [vmem:[%s2918_s13 + $0x30] sm:$0xff] }
 0xaa0   : > { %2446 = vmatprep.mubr.msk.f32.mxu1 %vm2720_vm4, %v2719_v35  ;;  %2445 = vmatpush3.msra.mxu1 %v773_v3 }
 0xaa1   : > { %2460 = vmatprep.subr.mxu1 %v2719_v35 }
 0xb5b   : > { %v1416_v55 = vpop.f32.mrf.mxu1 }
 0xb5c   : > { %2432 = vmatmul.mubr.msk.f32.vlgmr.msra.gmra.mxu0 %vm778_vm5, %v1416_v55  ;;  %v1860_v55 = vld [vmem:[%s2918_s13 + $0x20] sm:$0xff] }
 0xb5d   : > { %v2428_v56 = vpop.f32.mrf.mxu1  ;;  %2441 = vmatprep.mubr.msk.f32.mxu0 %vm2720_vm4, %v2719_v35 }
 0xb5e   : > { %v1859_v56 = vld [vmem:[%s2918_s13 + $0x18] sm:$0xff] }
 0xb5f   : > { %v1568_v57 = vpop.f32.mrf.mxu1 }
 0xb60   : > { %v1572_v59 = vsel %vm667_vm6, -inf, %v1568_v57  ;;  %v1858_v57 = vld [vmem:[%s2918_s13 + $0x10] sm:$0xff] }
 0xb61   : > { %v2438_v60 = vpop.f32.mrf.mxu1  ;;  %v1573_v61 = vsel %vm778_vm5, %v1572_v59, -inf }
 0xb62   : > { %1574 = vmax.xlane.f32.xlu1 %v1573_v61  ;;  %v1856_v60 = vld [vmem:[%s2918_s13] sm:$0xff] }
 0xb63   : > { %v2255_v61 = vld [vmem:[%s553_s21] ss:$0 sm:$0xff] }
 0xb73   : > { %1584 = vrot.lane.b32.xlu1 %v3005_v53, %s2731_s27 }
 0xbeb   : > { %v1575_v62 = vpop.xlane.xlu1 %1574 }
 0xbec   : > { %v1576_v63 = vsub.f32 %v1572_v59, %v1575_v62  ;;  %v1857_v59 = vld [vmem:[%s2918_s13 + $0x8] sm:$0xff] }
 0xbee   : > { %v1577_v0 = vmul.f32 1.442695, %v1576_v63 }
 0xbef   : > { %v1585_v1 = vpop.permute.xlu1 %1584 }
 0xbf0   : > { %2611 = vpow2.f32 %v1577_v0  ;;  %2440 = vmatpush3.msra.mxu0 %v1585_v1 }
 0xbf1   : > { %2449 = vmatprep.subr.mxu0 %v2719_v35 }
 0xbfd   : > { %v2612_v2 = vpop.eup %2611 }
 0xbfe   : > { %v1579_v58 = vsel %vm778_vm5, %v2612_v2, 0.0 }
 0xbff   : > { %1580 = vadd.xlane.f32.xlu0 %v1579_v58 }
 0xc1c   : > { %v1489_v5 = vpop.f32.mrf.mxu0 }
 0xc1d   : > { %v1493_v53 = vadd.f32 %v1489_v5, %v1251_v4 }
 0xc1e   : > { %v2433_v6 = vpop.f32.mrf.mxu0 }
 0xc88   : > { %v1581_v7 = vpop.xlane.xlu0 %1580 }
 0xc89   : > { %2613 = vrcp.f32 %v1581_v7 }
 0xc96   : > { %v2614_v8 = vpop.eup %2613 }
 0xc97   : > { %v1583_v9 = vmul.f32 %v2614_v8, %v2612_v2 }
 0xc99   : > { %2442 = vmatmul.mubr.msk.f32.vlgmr.msra.gmra.mxu0 %vm778_vm5, %v1583_v9 }
 0xc9a   : > { %2457 = vmatprep.mubr.msk.f32.mxu0 %vm2720_vm4, %v2719_v35  ;;  %2450 = vmatpush3.msra.mxu0 %v1766_v25 }
 0xc9b   : > { %2451 = vmatprep.subr.mxu0 %v2719_v35 }
 0xc9c   : > { %2452 = vmatpush3.msra.mxu0 %v1765_v26 }
 0xc9d   : > { %2453 = vmatprep.subr.mxu0 %v2719_v35 }
 0xd59   : > { %v1656_v10 = vpop.f32.mrf.mxu0 }
 0xd5a   : > { %2447 = vmatmul.mubr.msk.f32.vlgmr.msra.gmra.mxu1 %vm778_vm5, %v1656_v10 }
 0xd5b   : > { %v2443_v11 = vpop.f32.mrf.mxu0  ;;  %2492 = vmatprep.mubr.msk.f32.mxu1 %vm2720_vm4, %v2719_v35  ;;  %2461 = vmatpush3.msra.mxu1 %v1871_v41 }
 0xd5c   : > { %2462 = vmatprep.subr.mxu1 %v2719_v35 }
 0xd5d   : > { %2463 = vmatpush3.msra.mxu1 %v1870_v42 }
 0xd5e   : > { %2464 = vmatprep.subr.mxu1 %v2719_v35 }
 0xd5f   : > { %2465 = vmatpush3.msra.mxu1 %v1869_v44 }
 0xd60   : > { %2466 = vmatprep.subr.mxu1 %v2719_v35 }
 0xd61   : > { %2467 = vmatpush3.msra.mxu1 %v1868_v46 }
 0xd62   : > { %2468 = vmatprep.subr.mxu1 %v2719_v35 }
 0xd63   : > { %2469 = vmatpush3.msra.mxu1 %v1867_v47 }
 0xd64   : > { %2470 = vmatprep.subr.mxu1 %v2719_v35 }
 0xd65   : > { %2471 = vmatpush3.msra.mxu1 %v1866_v48 }
 0xd66   : > { %2472 = vmatprep.subr.mxu1 %v2719_v35 }
 0xd67   : > { %2473 = vmatpush3.msra.mxu1 %v1865_v49 }
 0xd68   : > { %2474 = vmatprep.subr.mxu1 %v2719_v35 }
 0xd69   : > { %2475 = vmatpush3.msra.mxu1 %v1864_v50 }
 0xd6a   : > { %2476 = vmatprep.subr.mxu1 %v2719_v35 }
 0xd6b   : > { %2477 = vmatpush3.msra.mxu1 %v1863_v51 }
 0xd6c   : > { %2478 = vmatprep.subr.mxu1 %v2719_v35 }
 0xd6d   : > { %2479 = vmatpush3.msra.mxu1 %v1862_v52 }
 0xd6e   : > { %2480 = vmatprep.subr.mxu1 %v2719_v35 }
 0xd6f   : > { %2481 = vmatpush3.msra.mxu1 %v1861_v54 }
 0xd70   : > { %2482 = vmatprep.subr.mxu1 %v2719_v35 }
 0xd71   : > { %2483 = vmatpush3.msra.mxu1 %v1860_v55 }
 0xd72   : > { %2484 = vmatprep.subr.mxu1 %v2719_v35 }
 0xd73   : > { %2485 = vmatpush3.msra.mxu1 %v1859_v56 }
 0xd74   : > { %2486 = vmatprep.subr.mxu1 %v2719_v35 }
 0xd75   : > { %2487 = vmatpush3.msra.mxu1 %v1858_v57 }
 0xd76   : > { %2488 = vmatprep.subr.mxu1 %v2719_v35 }
 0xd77   : > { %2489 = vmatpush3.msra.mxu1 %v1857_v59 }
 0xd78   : > { %2490 = vmatprep.subr.mxu1 %v2719_v35 }
 0xd79   : > { %2491 = vmatpush3.msra.mxu1 %v1856_v60 }
 0xe1a   : > { %v1729_v13 = vpop.f32.mrf.mxu1 }
 0xe1b   : > { %v1733_v14 = vadd.f32 %v1729_v13, %v1493_v53 }
 0xe1c   : > { %v2448_v16 = vpop.f32.mrf.mxu1 }
 0xe1d   : > { %v1734_v17 = vadd.f32 %v1733_v14, %v2973_v27  ;;  %v1764_v27 = vld [vmem:[%s2908_s22 + $0x8] sm:$0xff] }
 0xe1e   : > { %2454 = vmatpush3.msra.mxu0 %v1764_v27 }
 0xe1f   : > { %v3108_v18 = vadd.f32 %v1738_v15, %v1734_v17  ;;  %2455 = vmatprep.subr.mxu0 %v2719_v35  ;;  %v1874_v35 = vsub.s32 5, %v2993_v43 }
 0xe20   : > { %2456 = vmatpush3.msra.mxu0 %v1763_v28 }
 0xe21   : > { %v1740_v19 = vsel %vm668_vm3, %v3108_v18, 0.0  ;;  %v1875_v8 = vrot.slane %v2997_v45, %v1874_v35 }
 0xe22   : > { %1741 = vadd.xlane.f32.xlu1 %v1740_v19 }
 0xeab   : > { %v1742_v20 = vpop.xlane.xlu1 %1741 }
 0xeac   : > { %v1743_v21 = vmul.f32 0.03125, %v1742_v20 }
 0xeae   : > { %v1744_v22 = vsub.f32 %v3108_v18, %v1743_v21 }
 0xeb0   : > { %v1745_v23 = vmul.f32 %v1744_v22, %v1744_v22 }
 0xeb2   : > { %v1746_v24 = vsel %vm668_vm3, %v1745_v23, 0.0 }
 0xeb3   : > { %1747 = vadd.xlane.f32.xlu0 %v1746_v24 }
 0xf3c   : > { %v1748_v29 = vpop.xlane.xlu0 %1747 }
 0xf3d   : > { %v1749_v30 = vmul.f32 0.032258064, %v1748_v29 }
 0xf3f   : > { %v1750_v31 = vadd.f32 1e-05, %v1749_v30 }
 0xf41   : > { %2615 = vrsqrt.f32 %v1750_v31 }
 0xf4e   : > { %v2616_v36 = vpop.eup %2615 }
 0xf4f   : > { %v1752_v37 = vmul.f32 %v2616_v36, %v1744_v22 }
 0xf51   : > { %v1757_v39 = vmul.f32 %v1756_v34, %v1752_v37 }
 0xf53   : > { %v1762_v40 = vadd.f32 %v1761_v38, %v1757_v39 }
 0xf55   : > { %2458 = vmatmul.mubr.msk.f32.vlgmr.msra.gmra.mxu0 %vm668_vm3, %v1762_v40 }
0x1015   : > { %v1843_v62 = vpop.f32.mrf.mxu0 }
0x1016   : > { %v1844_v63 = vadd.f32 %v2255_v61, %v1843_v62 }
0x1017   : > { %v2459_v0 = vpop.f32.mrf.mxu0 }
0x1018   : > { %v1848_v1 = vmul.f32 0.044715, %v1844_v63  ;;  %v1847_v53 = vmul.f32 0.5, %v1844_v63 }
0x101a   : > { %v1849_v2 = vmul.f32 %v1848_v1, %v1844_v63 }
0x101c   : > { %v1850_v58 = vmul.f32 %v1849_v2, %v1844_v63 }
0x101e   : > { %v1851_v3 = vadd.f32 %v1850_v58, %v1844_v63 }
0x1020   : > { %v1852_v4 = vmul.f32 0.7978846, %v1851_v3 }
0x1022   : > { %2617 = vtanh.f32 %v1852_v4 }
0x102f   : > { %v2618_v5 = vpop.eup %2617 }
0x1030   : > { %v1854_v6 = vadd.f32 1.0, %v2618_v5 }
0x1032   : > { %v1855_v7 = vmul.f32 %v1854_v6, %v1847_v53 }
0x1034   : > { %2493 = vmatmul.mubr.f32.vlgmr.msra.gmra.mxu1 %v1855_v7 }
0x10f4   : > { %v1942_v9 = vpop.f32.mrf.mxu1 }
0x10f5   : > { %v1943_v10 = vadd.f32 %v1942_v9, %v1875_v8  ;;  %1951 = sbr.rel (%p2257_p1) target bundleno = 4850 (0x12f2), region = 80 }
0x10f6   : > { %v2494_v11 = vpop.f32.mrf.mxu1 }
0x10f7   : > { %v1946_v12 = vadd.f32 %v1943_v10, %v3108_v18 }
0x10f9   : > { %1947 = vst.msk [vmem:[#allocation2] sm:$0xff] %vm668_vm3, %v1946_v12 }
0x10fa   : > { %v1954_v13 = vsel %vm668_vm3, %v1946_v12, 0.0  ;;  %v1984_v45 = vld [vmem:[%s3252_s11 + $0x18] sm:$0xff]  ;;  %v2732_v18 = vmov 0.0   ;;  %v1983_v19 = vld [vmem:[%s3252_s11 + $0x10] sm:$0xff]  ;;  %vm2733_vm7 = vmmov 0   ;;  %v1982_v20 = vld [vmem:[%s3252_s11 + $0x8] sm:$0xff] }
0x10fb   : > { %1955 = vadd.xlane.f32.xlu0 %v1954_v13  ;;  %2495 = vmatprep.subr.mxu0 %v2732_v18  ;;  %v1981_v21 = vld [vmem:[%s3252_s11] sm:$0xff] }
0x10fc   : > { %2503 = vmatprep.mubr.msk.f32.mxu0 %vm2733_vm7, %v2732_v18  ;;  %2496 = vmatpush3.msra.mxu0 %v1984_v45  ;;  %v2258_v26 = vld [vmem:[%s3250_s9] ss:$0 sm:$0xff] }
0x10fd   : > { %2497 = vmatprep.subr.mxu0 %v2732_v18  ;;  %v2259_v28 = vld [vmem:[%s3251_s10] ss:$0 sm:$0xff] }
0x10fe   : > { %2498 = vmatpush3.msra.mxu0 %v1983_v19  ;;  %v2260_v31 = vld [vmem:[%s3289_s14] ss:$0 sm:$0xff] }
0x10ff   : > { %2499 = vmatprep.subr.mxu0 %v2732_v18 }
0x1100   : > { %2500 = vmatpush3.msra.mxu0 %v1982_v20 }
0x1101   : > { %2501 = vmatprep.subr.mxu0 %v2732_v18 }
0x1102   : > { %2502 = vmatpush3.msra.mxu0 %v1981_v21 }
0x1184   : > { %v1956_v14 = vpop.xlane.xlu0 %1955 }
0x1185   : > { %v1957_v15 = vmul.f32 0.03125, %v1956_v14 }
0x1187   : > { %v1958_v16 = vsub.f32 %v1946_v12, %v1957_v15 }
0x1189   : > { %v1959_v17 = vmul.f32 %v1958_v16, %v1958_v16 }
0x118b   : > { %v1960_v43 = vsel %vm668_vm3, %v1959_v17, 0.0 }
0x118c   : > { %1961 = vadd.xlane.f32.xlu0 %v1960_v43 }
0x1215   : > { %v1962_v22 = vpop.xlane.xlu0 %1961 }
0x1216   : > { %v1963_v23 = vmul.f32 0.032258064, %v1962_v22 }
0x1218   : > { %v1964_v24 = vadd.f32 1e-05, %v1963_v23 }
0x121a   : > { %2619 = vrsqrt.f32 %v1964_v24 }
0x1227   : > { %v2620_v25 = vpop.eup %2619 }
0x1228   : > { %v1966_v27 = vmul.f32 %v2620_v25, %v1958_v16 }
0x122a   : > { %v1973_v29 = vmul.f32 %v2258_v26, %v1966_v27 }
0x122c   : > { %v1980_v30 = vadd.f32 %v2259_v28, %v1973_v29 }
0x122e   : > { %2504 = vmatmul.mubr.msk.f32.vlgmr.msra.gmra.mxu0 %vm668_vm3, %v1980_v30 }
0x12ee   : > { %v2061_v32 = vpop.f32.mrf.mxu0 }
0x12ef   : > { %v2062_v33 = vadd.f32 %v2260_v31, %v2061_v32 }
0x12f0   : > { %v2505_v34 = vpop.f32.mrf.mxu0 }
0x12f1   : > { %2065 = vst [vmem:[%s527_s15] sm:$0xff] %v2062_v33 }
0x12f2 PF: > { %s3290_s23 = sld [smem:[#allocation9_spill]]  ;;  %s2080_s28 = sshll.u32 %s527_s15, 4  ;;  %s2081_s28 = int_to_ptr.vmem [resolvable:$true] %s2080_s28 }
0x12f3   : > { %s3291_s27 = sld [smem:[#allocation7_spill]]  ;;  %s2621_s16 = scalar_lea.vmem %s2081_s28, 128 }
0x12f4   : > { %s3293_s13 = sld [smem:[#allocation21_spill]]  ;;  %p2622_p2 = scmp.ne.s32.totalorder %s2081_s28, %s2621_s16 }
0x12f5   : > { %s2734_s29 = smov [#allocation3]  }
0x12f6   : > { %p2623_p4 = pnand %p2622_p2, %p2854_p3  ;;  %s2625_s12 = sshll.u32 %s2734_s29, 4  ;;  %s2626_s12 = int_to_ptr.vmem [resolvable:$false] %s2625_s12 }
0x12f7   : > { %s2627_s25 = scalar_lea.vmem %s2626_s12, 256  ;;  %p2628_p6 = scmp.lt.s32.totalorder %s2081_s28, %s2626_s12 }
0x12f8   : > { %s2263_s22 = sshll.u32 %s3290_s23, 7  ;;  %p2624_p5 = pneg %p2623_p4 }
0x12f9   : > { %s3294_s26 = sand.u32 1, %s3291_s27   ;;  %p2629_p7 = scmp.lt.s32.totalorder %s2627_s25, %s2621_s16 }
0x12fa   : > { %s2078_s24 = scalar_lea.hbm %s3293_s13, %s2263_s22  ;;  %s2067_s20 = scalar_lea.sflag [#allocation4], %s3294_s26 }
0x12fb   : > { %p2630_p8 = por %p2629_p7, %p2628_p6 }
0x12fd   : > { %p2631_p10 = pnand %p2630_p8, %p2624_p5 }
0x12ff   : > { %2634 = shalt.err (!%p2631_p10)
}
0x1300   : > { %s2635_s0 = scalar_lea.hbm %s2078_s24, 128  ;;  %s2639_s3 = scalar_lea.hbm %s3293_s13, 256 }
0x1301   : > { %p2636_p11 = scmp.ne.s32.totalorder %s2078_s24, %s2635_s0  ;;  %p2640_p0 = scmp.lt.s32.totalorder %s2078_s24, %s3293_s13 }
0x1302   : > { %p2641_p1 = scmp.lt.s32.totalorder %s2639_s3, %s2635_s0 }
0x1303   : > { %p2637_p12 = pnand %p2636_p11, %p2854_p3 }
0x1304   : > { %p2642_p2 = por %p2641_p1, %p2640_p0 }
0x1305   : > { %p2638_p13 = pneg %p2637_p12 }
0x1307   : > { %p2643_p4 = pnand %p2642_p2, %p2638_p13 }
0x1309   : > { %2646 = shalt.err (!%p2643_p4)
}
0x130a   : > { %2506 = dma.vmem_to_hbm [thread:$0]  (%p2854_p3), %s2081_s28, 128, %s2078_s24, %s2067_s20  }
0x130b PF: > { %s3295_s23 = sld [smem:[#allocation12_spill]] }
0x130c   : > { %s3296_s27 = sld [smem:[#allocation6_spill]] }
0x1311   : > { %p2512_p5 = scmp.ge.s32.totalorder %s3295_s23, 2 }
0x1312   : > { %s2092_s19 = sand.u32 1, %s3296_s27  }
0x1313   : > { %p2509_p6 = pnand %p2512_p5, %p2864_p9  ;;  %s2093_s21 = scalar_lea.sflag [#allocation4], %s2092_s19 }
0x1315   : > { %p2510_p7 = pneg %p2509_p6 }
0x1317   : > { %2680 = dma.done.wait (%p2510_p7), %s2093_s21, 128  }
0x1318   : > { %2682 = vsyncadd (%p2510_p7), %s2093_s21, 4294967168  ;;  %s26_s15 = sadd.s32 1, %s3295_s23   ;;  %s3298_s25 = sld [smem:[#allocation7_spill]] }
0x1319   : > { %p23_p8 = scmp.ge.s32.totalorder %s26_s15, 6   ;;  %s3299_s26 = sld [smem:[#allocation8_spill]] }
0x131a   : > { %s3300_s27 = sld [smem:[#allocation17_spill]] }
0x131b   : > { %s3301_s28 = sld [smem:[#allocation10_spill]]  ;;  %25 = sbr.rel (!%p23_p8) target bundleno = 10 (0xa), region = 133 }
0x131c   : > { %s3302_s29 = sld [smem:[#allocation11_spill]] }
0x131d   : > { %s3303_s30 = sld [smem:[#allocation13_spill]] }
0x131e   : > { %s3304_s14 = sld [smem:[#allocation15_spill]] }
0x1320   :  { %2098 = vsyncpa [#allocation4], 1 }
0x1321   :  { %2100 = vsyncpa [#allocation4 + $0x1], 1 }

</bundles_post_ra>
